<compile_context>
chip_gen: v5e
topology: v5e:2x2
jax: 0.10.0
libtpu: 0.0.40
codegen_flags: <defaults>
</compile_context>

<pallas_src>
import functools

import numpy as np
import jax
import jax.numpy as jnp
from jax.experimental import pallas as pl
from jax.experimental.pallas import tpu as pltpu

# Per conv block: (kernel, stride, pad, Cin, Cout)  (depthwise conv followed by 1x1 pointwise)
CONV_CFG = (
    (8, 2, 3, 14, 128),
    (4, 4, 2, 128, 64),
    (4, 4, 2, 64, 32),
    (4, 4, 0, 32, 16),
)
NUM_CLASSES = 3
LANE = 128  # lane width of one conv1-im2col tap block


def _geometry(L):
    """Per-stage output lengths + live (actually consumed) output counts."""
    Ls = [L]
    for (K, S, P, _, _) in CONV_CFG:
        Ls.append((Ls[-1] + 2 * P - K) // S + 1)
    live = [0] * 5
    live[4] = Ls[4]                      # the global average pool consumes every conv4 output
    for i in range(3, 0, -1):            # stage i+1 (cfg index i) reads stage-i outputs
        K, S, P, _, _ = CONV_CFG[i]
        live[i] = min(Ls[i], (live[i + 1] - 1) * S + K - P)
    live[0] = Ls[0]
    return Ls, live


def _cnneeg_kernel(x_ref, wf1_ref, wf2_ref, bf2_ref, wf3_ref, bf3_ref,
                   wf4_ref, bf4_ref, w1_ref, b1_ref, w2_ref, b2_ref, w3_ref, b3_ref,
                   out_ref, buf2_ref, buf3_ref, buf4_ref, buf5_ref,
                   *, BT, rows2, l2v, l3v, l4v):
    f32 = jnp.float32
    K2, _, _, C2i, C2o = CONV_CFG[1]
    K3, S3, P3, _, C3o = CONV_CFG[2]
    K4, S4, _, _, C4o = CONV_CFG[3]
    C1o = CONV_CFG[0][4]

    M2 = BT * rows2
    CH = M2
    for c in (256, 128, 64, 32, 16, 8):      # M-chunk: keeps matmul results in vregs
        if M2 % c == 0:
            CH = c
            break
    pow2 = (rows2 & (rows2 - 1)) == 0

    # ---------------- stages 1 + 2 (the big MXU work), M-chunked ----------------
    for ci in range(M2 // CH):
        r0 = ci * CH
        # stage 1: one matmul per stage-2 tap block, written lane-aligned into buf2.
        for t2 in range(K2):
            xt = x_ref[r0:r0 + CH, t2 * LANE:(t2 + 1) * LANE]            # (CH, 128) bf16
            y1 = jnp.dot(xt, wf1_ref[...], preferred_element_type=f32)   # (CH, 128) f32
            buf2_ref[r0:r0 + CH, t2 * C1o:(t2 + 1) * C1o] = y1.astype(buf2_ref.dtype)
        # stage 2: single K = K2*C2i (=512) matmul over the lane-concatenated taps.
        y2 = jnp.dot(buf2_ref[r0:r0 + CH, :], wf2_ref[...], preferred_element_type=f32)
        # Bias only on data rows; conv3's zero-pad rows stay exactly 0 (no per-batch stores).
        rid = jax.lax.broadcasted_iota(jnp.int32, (CH, C2o), 0) + r0
        p3 = (rid & (rows2 - 1)) if pow2 else jax.lax.rem(rid, rows2)
        is_data = (p3 >= P3) & (p3 < P3 + l2v)
        buf3_ref[r0:r0 + CH, :] = jnp.where(is_data, y2 + bf2_ref[...], 0.0)

    # ---------------- stage 3 (K == S): whole-tile strided tap reads, tiny f32 matmuls --------
    acc3 = jnp.zeros((BT * l3v, C3o), f32) + bf3_ref[...]                 # bias hoisted once
    for t3 in range(K3):
        tap = buf3_ref[pl.ds(t3, BT * l3v, stride=S3), :]                 # (BT*l3v, 64)
        acc3 = acc3 + jnp.dot(tap, wf3_ref[t3], preferred_element_type=f32)
    # P4 == 0 and every stage-3 live row is a stage-4 input row, so this is a plain full store.
    buf4_ref[...] = acc3

    # ---------------- stage 4 (K == S) ----------------
    acc4 = jnp.zeros((BT * l4v, C4o), f32) + bf4_ref[...]
    for t4 in range(K4):
        tap = buf4_ref[pl.ds(t4, BT * l4v, stride=S4), :]                 # (BT*l4v, 32)
        acc4 = acc4 + jnp.dot(tap, wf4_ref[t4], preferred_element_type=f32)
    buf5_ref[...] = acc4

    # ---------------- AdaptiveAvgPool1d(1) + Flatten + MLP head ----------------
    pooled = jnp.zeros((BT, C4o), f32)
    for l4 in range(l4v):
        pooled = pooled + buf5_ref[pl.ds(l4, BT, stride=l4v), :]
    pooled = pooled * (1.0 / l4v)
    h = jnp.maximum(jnp.dot(pooled, w1_ref[...], preferred_element_type=f32) + b1_ref[...], 0.0)
    h = jnp.maximum(jnp.dot(h, w2_ref[...], preferred_element_type=f32) + b2_ref[...], 0.0)
    out_ref[...] = jnp.dot(h, w3_ref[...], preferred_element_type=f32) + b3_ref[...]


def _fuse_conv(wdw, bdw, wpw, bpw):
    """Fuse depthwise + 1x1 pointwise: y = sum_t tap_t @ Wf[t] + bf (pure MXU work)."""
    wf = (wdw[:, :, None] * wpw[None, :, :]).astype(jnp.float32)   # (K, Cin, Cout)
    bf = (bdw @ wpw + bpw).astype(jnp.float32)                     # (1, Cout)
    return wf, bf


def cnneeg_forward(x_ncl, params, *, batch_tile=32):
    """Forward pass matching CNNEEG.forward (keep_batch_dim=True). x_ncl: (B, 14, L)."""
    B, C, L = x_ncl.shape
    K1, S1, P1, C1i, C1o = CONV_CFG[0]
    K2, S2, P2, C2i, C2o = CONV_CFG[1]
    K3, S3, P3, C3i, C3o = CONV_CFG[2]
    K4, S4, P4, C4i, C4o = CONV_CFG[3]
    assert C == C1i, f"expected {C1i} input channels, got {C}"
    assert K1 * C1i + 1 <= LANE, "conv1 im2col window must fit a 128-lane block"
    assert all(K == S for (K, S, _, _, _) in CONV_CFG[1:]), "stages 2-4 assume K == S"

    Ls, live = _geometry(L)
    L1, L2, L3, L4 = Ls[1:]
    l1v, l2v, l3v, l4v = live[1:]
    assert L4 >= 1, "input length too short for the conv stack"
    assert min(l1v, l2v, l3v, l4v) >= 1
    rows2 = l3v * S3                 # per-batch rows of the stage-3 padded ("p3") row space
    rows3 = l4v * S4                 # per-batch rows of the stage-4 padded ("p4") row space
    assert P3 + l2v <= rows2
    assert P4 == 0 and rows3 == l3v, "stage-4 handoff assumes P4 == 0 and a fully-live stage 3"

    # ---- batch tiling (BT elements per grid step) ----
    BT = B if B <= batch_tile else batch_tile
    Bp = ((B + BT - 1) // BT) * BT
    assert (BT * rows2) % 8 == 0

    # ---- wrapper-side conv1 im2col, laid out directly in the kernel's p3 row space ----
    x = x_ncl.astype(jnp.float32)
    xp = jnp.pad(x, ((0, 0), (0, 0), (P1, P1)))                            # (B, C, L + 2*P1)
    taps = jnp.stack([xp[:, :, t:t + S1 * (L1 - 1) + 1:S1] for t in range(K1)], axis=-1)
    win = jnp.transpose(taps, (0, 2, 3, 1)).reshape(B, L1, K1 * C1i)       # (B, L1, 112) (t1,c)
    win = jnp.concatenate(
        [win, jnp.ones((B, L1, 1), jnp.float32),                           # bias-indicator lane
         jnp.zeros((B, L1, LANE - K1 * C1i - 1), jnp.float32)], axis=-1)   # (B, L1, 128)
    n_p2 = (l2v - 1) * S2 + K2                                             # used conv2 padded idx
    hi = min(n_p2, P2 + L1)
    win_p2 = jnp.zeros((B, n_p2, LANE), jnp.float32)
    win_p2 = win_p2.at[:, P2:hi, :].set(win[:, :hi - P2, :])               # conv2 zero padding
    blocks = win_p2.reshape(B, l2v, K2 * LANE)                             # (B, l2v, 512)
    col = jnp.zeros((B, rows2, K2 * LANE), jnp.float32)
    col = col.at[:, P3:P3 + l2v, :].set(blocks)                            # conv3 zero-pad rows
    if Bp != B:
        col = jnp.concatenate(
            [col, jnp.zeros((Bp - B, rows2, K2 * LANE), jnp.float32)], axis=0)
    im2col = col.reshape(Bp * rows2, K2 * LANE).astype(jnp.bfloat16)

    # ---- fused weights (bf16 for the big MXU stages, f32 for the tiny ones) ----
    wf1, bf1 = _fuse_conv(*params["conv1"])          # (8,14,128), (1,128)
    wf2, bf2 = _fuse_conv(*params["conv2"])          # (4,128,64), (1,64)
    wf3, bf3 = _fuse_conv(*params["conv3"])          # (4,64,32),  (1,32)
    wf4, bf4 = _fuse_conv(*params["conv4"])          # (4,32,16),  (1,16)
    wf1_flat = jnp.concatenate(
        [wf1.reshape(K1 * C1i, C1o), bf1,
         jnp.zeros((LANE - K1 * C1i - 1, C1o), jnp.float32)], axis=0).astype(jnp.bfloat16)
    wf2_flat = wf2.reshape(K2 * C2i, C2o).astype(jnp.bfloat16)             # (512, 64)
    w1, b1 = params["fc1"]
    w2, b2 = params["fc2"]
    w3, b3 = params["fc3"]
    n_cls = b3.shape[-1]

    kernel = functools.partial(_cnneeg_kernel, BT=BT, rows2=rows2,
                               l2v=l2v, l3v=l3v, l4v=l4v)

    def _full(a):
        nd = a.ndim
        return pl.BlockSpec(a.shape, lambda i, nd=nd: (0,) * nd)

    out = pl.pallas_call(
        kernel,
        out_shape=jax.ShapeDtypeStruct((Bp, n_cls), jnp.float32),
        grid=(Bp // BT,),
        in_specs=[
            pl.BlockSpec((BT * rows2, K2 * LANE), lambda i: (i, 0)),
            _full(wf1_flat), _full(wf2_flat), _full(bf2),
            _full(wf3), _full(bf3), _full(wf4), _full(bf4),
            _full(w1), _full(b1), _full(w2), _full(b2), _full(w3), _full(b3),
        ],
        out_specs=pl.BlockSpec((BT, n_cls), lambda i: (i, 0)),
        scratch_shapes=[
            pltpu.VMEM((BT * rows2, K2 * C1o), jnp.bfloat16),  # lane-concat conv2 operand
            pltpu.VMEM((BT * rows2, C2o), jnp.float32),        # conv2 out / conv3 padded input
            pltpu.VMEM((BT * rows3, C3o), jnp.float32),        # conv3 out / conv4 input
            pltpu.VMEM((BT * l4v, C4o), jnp.float32),          # conv4 out (pool input)
        ],
        compiler_params=pltpu.CompilerParams(dimension_semantics=("parallel",)),
    )(im2col, wf1_flat, wf2_flat, bf2, wf3, bf3, wf4, bf4, w1, b1, w2, b2, w3, b3)
    return out[:B]


def init_params(key, input_channel=14, num_classes=3):
    """Deterministic synthetic weights in kernel-friendly layouts."""
    conv_shapes = [(8, input_channel, 128), (4, 128, 64), (4, 64, 32), (4, 32, 16)]
    fc_shapes = [(16, 16), (16, 8), (8, num_classes)]
    keys = iter(jax.random.split(key, 4 * len(conv_shapes) + 2 * len(fc_shapes)))
    params = {}
    for i, (K, Cin, Cout) in enumerate(conv_shapes):
        wdw = jax.random.normal(next(keys), (K, Cin), jnp.float32) * 0.2
        bdw = jax.random.normal(next(keys), (1, Cin), jnp.float32) * 0.05
        wpw = jax.random.normal(next(keys), (Cin, Cout), jnp.float32) * (1.0 / np.sqrt(Cin))
        bpw = jax.random.normal(next(keys), (1, Cout), jnp.float32) * 0.05
        params[f"conv{i + 1}"] = (wdw, bdw, wpw, bpw)
    for i, (fin, fout) in enumerate(fc_shapes):
        w = jax.random.normal(next(keys), (fin, fout), jnp.float32) * (1.0 / np.sqrt(fin))
        b = jax.random.normal(next(keys), (1, fout), jnp.float32) * 0.05
        params[f"fc{i + 1}"] = (w, b)
    return params


def ref_forward(x_ncl, params):
    """Pure-JAX f32 reference with identical semantics (for correctness check)."""
    x = jnp.transpose(x_ncl, (0, 2, 1)).astype(jnp.float32)
    for i, (K, S, P, Cin, Cout) in enumerate(CONV_CFG):
        wdw, bdw, wpw, bpw = params[f"conv{i + 1}"]
        L_in = x.shape[1]
        L_out = (L_in + 2 * P - K) // S + 1
        xp = jnp.pad(x, ((0, 0), (P, P), (0, 0)))
        acc = jnp.zeros((x.shape[0], L_out, Cin), jnp.float32)
        for t in range(K):
            acc = acc + xp[:, t:t + S * (L_out - 1) + 1:S, :] * wdw[t]
        acc = acc + bdw
        x = jnp.einsum("blc,cd->bld", acc, wpw) + bpw
    pooled = jnp.mean(x, axis=1)
    w1, b1 = params["fc1"]
    w2, b2 = params["fc2"]
    w3, b3 = params["fc3"]
    h = jax.nn.relu(pooled @ w1 + b1)
    h = jax.nn.relu(h @ w2 + b2)
    return h @ w3 + b3


if __name__ == "__main__":
    key = jax.random.PRNGKey(0)
    pkey, xkey = jax.random.split(key)
    params = init_params(pkey, input_channel=14, num_classes=NUM_CLASSES)

    B, C, L = 2, 14, 256  # PyTorch-style NCL input
    x = jax.random.normal(xkey, (B, C, L), jnp.float32)

    out = jax.jit(lambda a: cnneeg_forward(a, params))(x)
    out = jax.block_until_ready(out)

    ref = ref_forward(x, params)
    assert out.shape == (B, NUM_CLASSES), out.shape
    # Kernel uses bf16 MXU operands for conv1/conv2; compare against the pure-f32 reference
    # with a correspondingly looser tolerance.
    if not np.allclose(np.asarray(out), np.asarray(ref), rtol=2e-2, atol=2e-2):
        raise AssertionError(f"mismatch: pallas={np.asarray(out)} ref={np.asarray(ref)}")
    print("KERNEL_OK")
</pallas_src>

<mosaic_0001>
module attributes {stable_mosaic.version = 11 : i64} {
  func.func @_cnneeg_kernel(%arg0: i32, %arg1: memref<64x512xbf16, #tpu.memory_space<vmem>>, %arg2: memref<128x128xbf16, #tpu.memory_space<vmem>>, %arg3: memref<512x64xbf16, #tpu.memory_space<vmem>>, %arg4: memref<1x64xf32, #tpu.memory_space<vmem>>, %arg5: memref<4x64x32xf32, #tpu.memory_space<vmem>>, %arg6: memref<1x32xf32, #tpu.memory_space<vmem>>, %arg7: memref<4x32x16xf32, #tpu.memory_space<vmem>>, %arg8: memref<1x16xf32, #tpu.memory_space<vmem>>, %arg9: memref<16x16xf32, #tpu.memory_space<vmem>>, %arg10: memref<1x16xf32, #tpu.memory_space<vmem>>, %arg11: memref<16x8xf32, #tpu.memory_space<vmem>>, %arg12: memref<1x8xf32, #tpu.memory_space<vmem>>, %arg13: memref<8x3xf32, #tpu.memory_space<vmem>>, %arg14: memref<1x3xf32, #tpu.memory_space<vmem>>, %arg15: memref<2x3xf32, #tpu.memory_space<vmem>>, %arg16: memref<64x512xbf16, #tpu.memory_space<vmem>>, %arg17: memref<64x64xf32, #tpu.memory_space<vmem>>, %arg18: memref<16x32xf32, #tpu.memory_space<vmem>>, %arg19: memref<4x16xf32, #tpu.memory_space<vmem>>) attributes {dimension_semantics = [#tpu.dimension_semantics<parallel>], iteration_bounds = array<i64: 1>, scalar_prefetch = 0 : i64, scratch_operands = 4 : i64, tpu.core_type = #tpu.core_type<tc>, window_params = [{transform_indices = @transform_0, window_bounds = array<i64: 64, 512>}, {pipeline_mode = #tpu.pipeline_mode<synchronous>, transform_indices = @transform_1, window_bounds = array<i64: 128, 128>}, {pipeline_mode = #tpu.pipeline_mode<synchronous>, transform_indices = @transform_2, window_bounds = array<i64: 512, 64>}, {pipeline_mode = #tpu.pipeline_mode<synchronous>, transform_indices = @transform_3, window_bounds = array<i64: 1, 64>}, {pipeline_mode = #tpu.pipeline_mode<synchronous>, transform_indices = @transform_4, window_bounds = array<i64: 4, 64, 32>}, {pipeline_mode = #tpu.pipeline_mode<synchronous>, transform_indices = @transform_5, window_bounds = array<i64: 1, 32>}, {pipeline_mode = #tpu.pipeline_mode<synchronous>, transform_indices = @transform_6, window_bounds = array<i64: 4, 32, 16>}, {pipeline_mode = #tpu.pipeline_mode<synchronous>, transform_indices = @transform_7, window_bounds = array<i64: 1, 16>}, {pipeline_mode = #tpu.pipeline_mode<synchronous>, transform_indices = @transform_8, window_bounds = array<i64: 16, 16>}, {pipeline_mode = #tpu.pipeline_mode<synchronous>, transform_indices = @transform_9, window_bounds = array<i64: 1, 16>}, {pipeline_mode = #tpu.pipeline_mode<synchronous>, transform_indices = @transform_10, window_bounds = array<i64: 16, 8>}, {pipeline_mode = #tpu.pipeline_mode<synchronous>, transform_indices = @transform_11, window_bounds = array<i64: 1, 8>}, {pipeline_mode = #tpu.pipeline_mode<synchronous>, transform_indices = @transform_12, window_bounds = array<i64: 8, 3>}, {pipeline_mode = #tpu.pipeline_mode<synchronous>, transform_indices = @transform_13, window_bounds = array<i64: 1, 3>}, {transform_indices = @transform_14, window_bounds = array<i64: 2, 3>}]} {
    %c0 = arith.constant 0 : index
    %c0_0 = arith.constant 0 : index
    %0 = vector.load %arg1[%c0, %c0_0] : memref<64x512xbf16, #tpu.memory_space<vmem>>, vector<64x128xbf16>
    %c0_1 = arith.constant 0 : index
    %c0_2 = arith.constant 0 : index
    %1 = vector.load %arg2[%c0_1, %c0_2] : memref<128x128xbf16, #tpu.memory_space<vmem>>, vector<128x128xbf16>
    %cst = arith.constant dense<0.000000e+00> : vector<64x128xf32>
    %2 = tpu.matmul %0, %1, %cst {dimension_numbers = #tpu.dot_dimension_numbers<[1], [0], [0], [1], [0, 0, 1, 1], [], []>} : vector<64x128xbf16>, vector<128x128xbf16>, vector<64x128xf32> -> vector<64x128xf32>
    %3 = arith.truncf %2 : vector<64x128xf32> to vector<64x128xbf16>
    %c0_3 = arith.constant 0 : index
    %c0_4 = arith.constant 0 : index
    %4 = vector.load %arg16[%c0_3, %c0_4] : memref<64x512xbf16, #tpu.memory_space<vmem>>, vector<64x128xbf16>
    tpu.vector_store %arg16[%c0_3, %c0_4], %3 {strides = array<i32>} : memref<64x512xbf16, #tpu.memory_space<vmem>>, vector<64x128xbf16>,
    %c0_5 = arith.constant 0 : index
    %c128 = arith.constant 128 : index
    %5 = vector.load %arg1[%c0_5, %c128] : memref<64x512xbf16, #tpu.memory_space<vmem>>, vector<64x128xbf16>
    %c0_6 = arith.constant 0 : index
    %c0_7 = arith.constant 0 : index
    %6 = vector.load %arg2[%c0_6, %c0_7] : memref<128x128xbf16, #tpu.memory_space<vmem>>, vector<128x128xbf16>
    %cst_8 = arith.constant dense<0.000000e+00> : vector<64x128xf32>
    %7 = tpu.matmul %5, %6, %cst_8 {dimension_numbers = #tpu.dot_dimension_numbers<[1], [0], [0], [1], [0, 0, 1, 1], [], []>} : vector<64x128xbf16>, vector<128x128xbf16>, vector<64x128xf32> -> vector<64x128xf32>
    %8 = arith.truncf %7 : vector<64x128xf32> to vector<64x128xbf16>
    %c0_9 = arith.constant 0 : index
    %c128_10 = arith.constant 128 : index
    %9 = vector.load %arg16[%c0_9, %c128_10] : memref<64x512xbf16, #tpu.memory_space<vmem>>, vector<64x128xbf16>
    tpu.vector_store %arg16[%c0_9, %c128_10], %8 {strides = array<i32>} : memref<64x512xbf16, #tpu.memory_space<vmem>>, vector<64x128xbf16>,
    %c0_11 = arith.constant 0 : index
    %c256 = arith.constant 256 : index
    %10 = vector.load %arg1[%c0_11, %c256] : memref<64x512xbf16, #tpu.memory_space<vmem>>, vector<64x128xbf16>
    %c0_12 = arith.constant 0 : index
    %c0_13 = arith.constant 0 : index
    %11 = vector.load %arg2[%c0_12, %c0_13] : memref<128x128xbf16, #tpu.memory_space<vmem>>, vector<128x128xbf16>
    %cst_14 = arith.constant dense<0.000000e+00> : vector<64x128xf32>
    %12 = tpu.matmul %10, %11, %cst_14 {dimension_numbers = #tpu.dot_dimension_numbers<[1], [0], [0], [1], [0, 0, 1, 1], [], []>} : vector<64x128xbf16>, vector<128x128xbf16>, vector<64x128xf32> -> vector<64x128xf32>
    %13 = arith.truncf %12 : vector<64x128xf32> to vector<64x128xbf16>
    %c0_15 = arith.constant 0 : index
    %c256_16 = arith.constant 256 : index
    %14 = vector.load %arg16[%c0_15, %c256_16] : memref<64x512xbf16, #tpu.memory_space<vmem>>, vector<64x128xbf16>
    tpu.vector_store %arg16[%c0_15, %c256_16], %13 {strides = array<i32>} : memref<64x512xbf16, #tpu.memory_space<vmem>>, vector<64x128xbf16>,
    %c0_17 = arith.constant 0 : index
    %c384 = arith.constant 384 : index
    %15 = vector.load %arg1[%c0_17, %c384] : memref<64x512xbf16, #tpu.memory_space<vmem>>, vector<64x128xbf16>
    %c0_18 = arith.constant 0 : index
    %c0_19 = arith.constant 0 : index
    %16 = vector.load %arg2[%c0_18, %c0_19] : memref<128x128xbf16, #tpu.memory_space<vmem>>, vector<128x128xbf16>
    %cst_20 = arith.constant dense<0.000000e+00> : vector<64x128xf32>
    %17 = tpu.matmul %15, %16, %cst_20 {dimension_numbers = #tpu.dot_dimension_numbers<[1], [0], [0], [1], [0, 0, 1, 1], [], []>} : vector<64x128xbf16>, vector<128x128xbf16>, vector<64x128xf32> -> vector<64x128xf32>
    %18 = arith.truncf %17 : vector<64x128xf32> to vector<64x128xbf16>
    %c0_21 = arith.constant 0 : index
    %c384_22 = arith.constant 384 : index
    %19 = vector.load %arg16[%c0_21, %c384_22] : memref<64x512xbf16, #tpu.memory_space<vmem>>, vector<64x128xbf16>
    tpu.vector_store %arg16[%c0_21, %c384_22], %18 {strides = array<i32>} : memref<64x512xbf16, #tpu.memory_space<vmem>>, vector<64x128xbf16>,
    %c0_23 = arith.constant 0 : index
    %c0_24 = arith.constant 0 : index
    %20 = vector.load %arg16[%c0_23, %c0_24] : memref<64x512xbf16, #tpu.memory_space<vmem>>, vector<64x512xbf16>
    %c0_25 = arith.constant 0 : index
    %c0_26 = arith.constant 0 : index
    %21 = vector.load %arg3[%c0_25, %c0_26] : memref<512x64xbf16, #tpu.memory_space<vmem>>, vector<512x64xbf16>
    %cst_27 = arith.constant dense<0.000000e+00> : vector<64x64xf32>
    %22 = tpu.matmul %20, %21, %cst_27 {dimension_numbers = #tpu.dot_dimension_numbers<[1], [0], [0], [1], [0, 0, 1, 1], [], []>} : vector<64x512xbf16>, vector<512x64xbf16>, vector<64x64xf32> -> vector<64x64xf32>
    %23 = tpu.iota {dimensions = array<i32: 0>} : vector<64x64xi32>
    %c0_i32 = arith.constant 0 : i32
    %24 = vector.broadcast %c0_i32 : i32 to vector<64x64xi32>
    %25 = arith.addi %23, %24 : vector<64x64xi32>
    %c31_i32 = arith.constant 31 : i32
    %26 = vector.broadcast %c31_i32 : i32 to vector<64x64xi32>
    %27 = arith.andi %25, %26 : vector<64x64xi32>
    %c2_i32 = arith.constant 2 : i32
    %28 = vector.broadcast %c2_i32 : i32 to vector<64x64xi32>
    %29 = arith.cmpi sge, %27, %28 : vector<64x64xi32>
    %c32_i32 = arith.constant 32 : i32
    %30 = vector.broadcast %c32_i32 : i32 to vector<64x64xi32>
    %31 = arith.cmpi slt, %27, %30 : vector<64x64xi32>
    %32 = arith.andi %29, %31 : vector<64x64xi1>
    %c0_28 = arith.constant 0 : index
    %c0_29 = arith.constant 0 : index
    %33 = vector.load %arg4[%c0_28, %c0_29] : memref<1x64xf32, #tpu.memory_space<vmem>>, vector<1x64xf32>
    %34 = vector.broadcast %33 : vector<1x64xf32> to vector<64x64xf32>
    %35 = arith.addf %22, %34 : vector<64x64xf32>
    %cst_30 = arith.constant 0.000000e+00 : f32
    %36 = vector.broadcast %cst_30 : f32 to vector<64x64xf32>
    %37 = arith.select %32, %35, %36 : vector<64x64xi1>, vector<64x64xf32>
    %c0_31 = arith.constant 0 : index
    %c0_32 = arith.constant 0 : index
    %38 = vector.load %arg17[%c0_31, %c0_32] : memref<64x64xf32, #tpu.memory_space<vmem>>, vector<64x64xf32>
    tpu.vector_store %arg17[%c0_31, %c0_32], %37 {strides = array<i32>} : memref<64x64xf32, #tpu.memory_space<vmem>>, vector<64x64xf32>,
    %cst_33 = arith.constant 0.000000e+00 : f32
    %39 = vector.broadcast %cst_33 : f32 to vector<16x32xf32>
    %c0_34 = arith.constant 0 : index
    %c0_35 = arith.constant 0 : index
    %40 = vector.load %arg6[%c0_34, %c0_35] : memref<1x32xf32, #tpu.memory_space<vmem>>, vector<1x32xf32>
    %41 = vector.broadcast %40 : vector<1x32xf32> to vector<16x32xf32>
    %42 = arith.addf %39, %41 : vector<16x32xf32>
    %c0_36 = arith.constant 0 : index
    %c0_37 = arith.constant 0 : index
    %43 = tpu.strided_load %arg17[%c0_36, %c0_37] {strides = array<i32: 4, 1>} : memref<64x64xf32, #tpu.memory_space<vmem>>, vector<16x64xf32>
    %c0_38 = arith.constant 0 : index
    %c0_39 = arith.constant 0 : index
    %c0_40 = arith.constant 0 : index
    %44 = vector.load %arg5[%c0_38, %c0_39, %c0_40] : memref<4x64x32xf32, #tpu.memory_space<vmem>>, vector<1x64x32xf32>
    %45 = vector.shape_cast %44 : vector<1x64x32xf32> to vector<64x32xf32>
    %cst_41 = arith.constant dense<0.000000e+00> : vector<16x32xf32>
    %46 = tpu.matmul %43, %45, %cst_41 {dimension_numbers = #tpu.dot_dimension_numbers<[1], [0], [0], [1], [0, 0, 1, 1], [], []>} : vector<16x64xf32>, vector<64x32xf32>, vector<16x32xf32> -> vector<16x32xf32>
    %47 = arith.addf %42, %46 : vector<16x32xf32>
    %c1 = arith.constant 1 : index
    %c0_42 = arith.constant 0 : index
    %48 = tpu.strided_load %arg17[%c1, %c0_42] {strides = array<i32: 4, 1>} : memref<64x64xf32, #tpu.memory_space<vmem>>, vector<16x64xf32>
    %c1_43 = arith.constant 1 : index
    %c0_44 = arith.constant 0 : index
    %c0_45 = arith.constant 0 : index
    %49 = vector.load %arg5[%c1_43, %c0_44, %c0_45] : memref<4x64x32xf32, #tpu.memory_space<vmem>>, vector<1x64x32xf32>
    %50 = vector.shape_cast %49 : vector<1x64x32xf32> to vector<64x32xf32>
    %cst_46 = arith.constant dense<0.000000e+00> : vector<16x32xf32>
    %51 = tpu.matmul %48, %50, %cst_46 {dimension_numbers = #tpu.dot_dimension_numbers<[1], [0], [0], [1], [0, 0, 1, 1], [], []>} : vector<16x64xf32>, vector<64x32xf32>, vector<16x32xf32> -> vector<16x32xf32>
    %52 = arith.addf %47, %51 : vector<16x32xf32>
    %c2 = arith.constant 2 : index
    %c0_47 = arith.constant 0 : index
    %53 = tpu.strided_load %arg17[%c2, %c0_47] {strides = array<i32: 4, 1>} : memref<64x64xf32, #tpu.memory_space<vmem>>, vector<16x64xf32>
    %c2_48 = arith.constant 2 : index
    %c0_49 = arith.constant 0 : index
    %c0_50 = arith.constant 0 : index
    %54 = vector.load %arg5[%c2_48, %c0_49, %c0_50] : memref<4x64x32xf32, #tpu.memory_space<vmem>>, vector<1x64x32xf32>
    %55 = vector.shape_cast %54 : vector<1x64x32xf32> to vector<64x32xf32>
    %cst_51 = arith.constant dense<0.000000e+00> : vector<16x32xf32>
    %56 = tpu.matmul %53, %55, %cst_51 {dimension_numbers = #tpu.dot_dimension_numbers<[1], [0], [0], [1], [0, 0, 1, 1], [], []>} : vector<16x64xf32>, vector<64x32xf32>, vector<16x32xf32> -> vector<16x32xf32>
    %57 = arith.addf %52, %56 : vector<16x32xf32>
    %c3 = arith.constant 3 : index
    %c0_52 = arith.constant 0 : index
    %58 = tpu.strided_load %arg17[%c3, %c0_52] {strides = array<i32: 4, 1>} : memref<64x64xf32, #tpu.memory_space<vmem>>, vector<16x64xf32>
    %c3_53 = arith.constant 3 : index
    %c0_54 = arith.constant 0 : index
    %c0_55 = arith.constant 0 : index
    %59 = vector.load %arg5[%c3_53, %c0_54, %c0_55] : memref<4x64x32xf32, #tpu.memory_space<vmem>>, vector<1x64x32xf32>
    %60 = vector.shape_cast %59 : vector<1x64x32xf32> to vector<64x32xf32>
    %cst_56 = arith.constant dense<0.000000e+00> : vector<16x32xf32>
    %61 = tpu.matmul %58, %60, %cst_56 {dimension_numbers = #tpu.dot_dimension_numbers<[1], [0], [0], [1], [0, 0, 1, 1], [], []>} : vector<16x64xf32>, vector<64x32xf32>, vector<16x32xf32> -> vector<16x32xf32>
    %62 = arith.addf %57, %61 : vector<16x32xf32>
    %c0_57 = arith.constant 0 : index
    %c0_58 = arith.constant 0 : index
    %63 = vector.load %arg18[%c0_57, %c0_58] : memref<16x32xf32, #tpu.memory_space<vmem>>, vector<16x32xf32>
    tpu.vector_store %arg18[%c0_57, %c0_58], %62 {strides = array<i32>} : memref<16x32xf32, #tpu.memory_space<vmem>>, vector<16x32xf32>,
    %cst_59 = arith.constant 0.000000e+00 : f32
    %64 = vector.broadcast %cst_59 : f32 to vector<4x16xf32>
    %c0_60 = arith.constant 0 : index
    %c0_61 = arith.constant 0 : index
    %65 = vector.load %arg8[%c0_60, %c0_61] : memref<1x16xf32, #tpu.memory_space<vmem>>, vector<1x16xf32>
    %66 = vector.broadcast %65 : vector<1x16xf32> to vector<4x16xf32>
    %67 = arith.addf %64, %66 : vector<4x16xf32>
    %c0_62 = arith.constant 0 : index
    %c0_63 = arith.constant 0 : index
    %68 = tpu.strided_load %arg18[%c0_62, %c0_63] {strides = array<i32: 4, 1>} : memref<16x32xf32, #tpu.memory_space<vmem>>, vector<4x32xf32>
    %c0_64 = arith.constant 0 : index
    %c0_65 = arith.constant 0 : index
    %c0_66 = arith.constant 0 : index
    %69 = vector.load %arg7[%c0_64, %c0_65, %c0_66] : memref<4x32x16xf32, #tpu.memory_space<vmem>>, vector<1x32x16xf32>
    %70 = vector.shape_cast %69 : vector<1x32x16xf32> to vector<32x16xf32>
    %cst_67 = arith.constant dense<0.000000e+00> : vector<4x16xf32>
    %71 = tpu.matmul %68, %70, %cst_67 {dimension_numbers = #tpu.dot_dimension_numbers<[1], [0], [0], [1], [0, 0, 1, 1], [], []>} : vector<4x32xf32>, vector<32x16xf32>, vector<4x16xf32> -> vector<4x16xf32>
    %72 = arith.addf %67, %71 : vector<4x16xf32>
    %c1_68 = arith.constant 1 : index
    %c0_69 = arith.constant 0 : index
    %73 = tpu.strided_load %arg18[%c1_68, %c0_69] {strides = array<i32: 4, 1>} : memref<16x32xf32, #tpu.memory_space<vmem>>, vector<4x32xf32>
    %c1_70 = arith.constant 1 : index
    %c0_71 = arith.constant 0 : index
    %c0_72 = arith.constant 0 : index
    %74 = vector.load %arg7[%c1_70, %c0_71, %c0_72] : memref<4x32x16xf32, #tpu.memory_space<vmem>>, vector<1x32x16xf32>
    %75 = vector.shape_cast %74 : vector<1x32x16xf32> to vector<32x16xf32>
    %cst_73 = arith.constant dense<0.000000e+00> : vector<4x16xf32>
    %76 = tpu.matmul %73, %75, %cst_73 {dimension_numbers = #tpu.dot_dimension_numbers<[1], [0], [0], [1], [0, 0, 1, 1], [], []>} : vector<4x32xf32>, vector<32x16xf32>, vector<4x16xf32> -> vector<4x16xf32>
    %77 = arith.addf %72, %76 : vector<4x16xf32>
    %c2_74 = arith.constant 2 : index
    %c0_75 = arith.constant 0 : index
    %78 = tpu.strided_load %arg18[%c2_74, %c0_75] {strides = array<i32: 4, 1>} : memref<16x32xf32, #tpu.memory_space<vmem>>, vector<4x32xf32>
    %c2_76 = arith.constant 2 : index
    %c0_77 = arith.constant 0 : index
    %c0_78 = arith.constant 0 : index
    %79 = vector.load %arg7[%c2_76, %c0_77, %c0_78] : memref<4x32x16xf32, #tpu.memory_space<vmem>>, vector<1x32x16xf32>
    %80 = vector.shape_cast %79 : vector<1x32x16xf32> to vector<32x16xf32>
    %cst_79 = arith.constant dense<0.000000e+00> : vector<4x16xf32>
    %81 = tpu.matmul %78, %80, %cst_79 {dimension_numbers = #tpu.dot_dimension_numbers<[1], [0], [0], [1], [0, 0, 1, 1], [], []>} : vector<4x32xf32>, vector<32x16xf32>, vector<4x16xf32> -> vector<4x16xf32>
    %82 = arith.addf %77, %81 : vector<4x16xf32>
    %c3_80 = arith.constant 3 : index
    %c0_81 = arith.constant 0 : index
    %83 = tpu.strided_load %arg18[%c3_80, %c0_81] {strides = array<i32: 4, 1>} : memref<16x32xf32, #tpu.memory_space<vmem>>, vector<4x32xf32>
    %c3_82 = arith.constant 3 : index
    %c0_83 = arith.constant 0 : index
    %c0_84 = arith.constant 0 : index
    %84 = vector.load %arg7[%c3_82, %c0_83, %c0_84] : memref<4x32x16xf32, #tpu.memory_space<vmem>>, vector<1x32x16xf32>
    %85 = vector.shape_cast %84 : vector<1x32x16xf32> to vector<32x16xf32>
    %cst_85 = arith.constant dense<0.000000e+00> : vector<4x16xf32>
    %86 = tpu.matmul %83, %85, %cst_85 {dimension_numbers = #tpu.dot_dimension_numbers<[1], [0], [0], [1], [0, 0, 1, 1], [], []>} : vector<4x32xf32>, vector<32x16xf32>, vector<4x16xf32> -> vector<4x16xf32>
    %87 = arith.addf %82, %86 : vector<4x16xf32>
    %c0_86 = arith.constant 0 : index
    %c0_87 = arith.constant 0 : index
    %88 = vector.load %arg19[%c0_86, %c0_87] : memref<4x16xf32, #tpu.memory_space<vmem>>, vector<4x16xf32>
    tpu.vector_store %arg19[%c0_86, %c0_87], %87 {strides = array<i32>} : memref<4x16xf32, #tpu.memory_space<vmem>>, vector<4x16xf32>,
    %cst_88 = arith.constant 0.000000e+00 : f32
    %89 = vector.broadcast %cst_88 : f32 to vector<2x16xf32>
    %c0_89 = arith.constant 0 : index
    %c0_90 = arith.constant 0 : index
    %90 = tpu.strided_load %arg19[%c0_89, %c0_90] {strides = array<i32: 2, 1>} : memref<4x16xf32, #tpu.memory_space<vmem>>, vector<2x16xf32>
    %91 = arith.addf %89, %90 : vector<2x16xf32>
    %c1_91 = arith.constant 1 : index
    %c0_92 = arith.constant 0 : index
    %92 = tpu.strided_load %arg19[%c1_91, %c0_92] {strides = array<i32: 2, 1>} : memref<4x16xf32, #tpu.memory_space<vmem>>, vector<2x16xf32>
    %93 = arith.addf %91, %92 : vector<2x16xf32>
    %cst_93 = arith.constant 5.000000e-01 : f32
    %94 = vector.broadcast %cst_93 : f32 to vector<2x16xf32>
    %95 = arith.mulf %93, %94 : vector<2x16xf32>
    %c0_94 = arith.constant 0 : index
    %c0_95 = arith.constant 0 : index
    %96 = vector.load %arg9[%c0_94, %c0_95] : memref<16x16xf32, #tpu.memory_space<vmem>>, vector<16x16xf32>
    %cst_96 = arith.constant dense<0.000000e+00> : vector<2x16xf32>
    %97 = tpu.matmul %95, %96, %cst_96 {dimension_numbers = #tpu.dot_dimension_numbers<[1], [0], [0], [1], [0, 0, 1, 1], [], []>} : vector<2x16xf32>, vector<16x16xf32>, vector<2x16xf32> -> vector<2x16xf32>
    %c0_97 = arith.constant 0 : index
    %c0_98 = arith.constant 0 : index
    %98 = vector.load %arg10[%c0_97, %c0_98] : memref<1x16xf32, #tpu.memory_space<vmem>>, vector<1x16xf32>
    %99 = vector.broadcast %98 : vector<1x16xf32> to vector<2x16xf32>
    %100 = arith.addf %97, %99 : vector<2x16xf32>
    %cst_99 = arith.constant 0.000000e+00 : f32
    %101 = vector.broadcast %cst_99 : f32 to vector<2x16xf32>
    %102 = arith.maximumf %100, %101 : vector<2x16xf32>
    %c0_100 = arith.constant 0 : index
    %c0_101 = arith.constant 0 : index
    %103 = vector.load %arg11[%c0_100, %c0_101] : memref<16x8xf32, #tpu.memory_space<vmem>>, vector<16x8xf32>
    %cst_102 = arith.constant dense<0.000000e+00> : vector<2x8xf32>
    %104 = tpu.matmul %102, %103, %cst_102 {dimension_numbers = #tpu.dot_dimension_numbers<[1], [0], [0], [1], [0, 0, 1, 1], [], []>} : vector<2x16xf32>, vector<16x8xf32>, vector<2x8xf32> -> vector<2x8xf32>
    %c0_103 = arith.constant 0 : index
    %c0_104 = arith.constant 0 : index
    %105 = vector.load %arg12[%c0_103, %c0_104] : memref<1x8xf32, #tpu.memory_space<vmem>>, vector<1x8xf32>
    %106 = vector.broadcast %105 : vector<1x8xf32> to vector<2x8xf32>
    %107 = arith.addf %104, %106 : vector<2x8xf32>
    %cst_105 = arith.constant 0.000000e+00 : f32
    %108 = vector.broadcast %cst_105 : f32 to vector<2x8xf32>
    %109 = arith.maximumf %107, %108 : vector<2x8xf32>
    %c0_106 = arith.constant 0 : index
    %c0_107 = arith.constant 0 : index
    %110 = vector.load %arg13[%c0_106, %c0_107] : memref<8x3xf32, #tpu.memory_space<vmem>>, vector<8x3xf32>
    %cst_108 = arith.constant dense<0.000000e+00> : vector<2x3xf32>
    %111 = tpu.matmul %109, %110, %cst_108 {dimension_numbers = #tpu.dot_dimension_numbers<[1], [0], [0], [1], [0, 0, 1, 1], [], []>} : vector<2x8xf32>, vector<8x3xf32>, vector<2x3xf32> -> vector<2x3xf32>
    %c0_109 = arith.constant 0 : index
    %c0_110 = arith.constant 0 : index
    %112 = vector.load %arg14[%c0_109, %c0_110] : memref<1x3xf32, #tpu.memory_space<vmem>>, vector<1x3xf32>
    %113 = vector.broadcast %112 : vector<1x3xf32> to vector<2x3xf32>
    %114 = arith.addf %111, %113 : vector<2x3xf32>
    %c0_111 = arith.constant 0 : index
    %c0_112 = arith.constant 0 : index
    %115 = vector.load %arg15[%c0_111, %c0_112] : memref<2x3xf32, #tpu.memory_space<vmem>>, vector<2x3xf32>
    tpu.vector_store %arg15[%c0_111, %c0_112], %114 {strides = array<i32>} : memref<2x3xf32, #tpu.memory_space<vmem>>, vector<2x3xf32>,
    return
  }
  func.func @transform_0(%arg0: i32) -> (i32, i32) {
    %c0_i32 = arith.constant 0 : i32
    %c0_i32_0 = arith.constant 0 : i32
    return %arg0, %c0_i32 : i32, i32
  }
  func.func @transform_1(%arg0: i32) -> (i32, i32) {
    %c0_i32 = arith.constant 0 : i32
    %c0_i32_0 = arith.constant 0 : i32
    %c0_i32_1 = arith.constant 0 : i32
    return %c0_i32, %c0_i32_0 : i32, i32
  }
  func.func @transform_2(%arg0: i32) -> (i32, i32) {
    %c0_i32 = arith.constant 0 : i32
    %c0_i32_0 = arith.constant 0 : i32
    %c0_i32_1 = arith.constant 0 : i32
    return %c0_i32, %c0_i32_0 : i32, i32
  }
  func.func @transform_3(%arg0: i32) -> (i32, i32) {
    %c0_i32 = arith.constant 0 : i32
    %c0_i32_0 = arith.constant 0 : i32
    %c0_i32_1 = arith.constant 0 : i32
    return %c0_i32, %c0_i32_0 : i32, i32
  }
  func.func @transform_4(%arg0: i32) -> (i32, i32, i32) {
    %c0_i32 = arith.constant 0 : i32
    %c0_i32_0 = arith.constant 0 : i32
    %c0_i32_1 = arith.constant 0 : i32
    %c0_i32_2 = arith.constant 0 : i32
    return %c0_i32, %c0_i32_0, %c0_i32_1 : i32, i32, i32
  }
  func.func @transform_5(%arg0: i32) -> (i32, i32) {
    %c0_i32 = arith.constant 0 : i32
    %c0_i32_0 = arith.constant 0 : i32
    %c0_i32_1 = arith.constant 0 : i32
    return %c0_i32, %c0_i32_0 : i32, i32
  }
  func.func @transform_6(%arg0: i32) -> (i32, i32, i32) {
    %c0_i32 = arith.constant 0 : i32
    %c0_i32_0 = arith.constant 0 : i32
    %c0_i32_1 = arith.constant 0 : i32
    %c0_i32_2 = arith.constant 0 : i32
    return %c0_i32, %c0_i32_0, %c0_i32_1 : i32, i32, i32
  }
  func.func @transform_7(%arg0: i32) -> (i32, i32) {
    %c0_i32 = arith.constant 0 : i32
    %c0_i32_0 = arith.constant 0 : i32
    %c0_i32_1 = arith.constant 0 : i32
    return %c0_i32, %c0_i32_0 : i32, i32
  }
  func.func @transform_8(%arg0: i32) -> (i32, i32) {
    %c0_i32 = arith.constant 0 : i32
    %c0_i32_0 = arith.constant 0 : i32
    %c0_i32_1 = arith.constant 0 : i32
    return %c0_i32, %c0_i32_0 : i32, i32
  }
  func.func @transform_9(%arg0: i32) -> (i32, i32) {
    %c0_i32 = arith.constant 0 : i32
    %c0_i32_0 = arith.constant 0 : i32
    %c0_i32_1 = arith.constant 0 : i32
    return %c0_i32, %c0_i32_0 : i32, i32
  }
  func.func @transform_10(%arg0: i32) -> (i32, i32) {
    %c0_i32 = arith.constant 0 : i32
    %c0_i32_0 = arith.constant 0 : i32
    %c0_i32_1 = arith.constant 0 : i32
    return %c0_i32, %c0_i32_0 : i32, i32
  }
  func.func @transform_11(%arg0: i32) -> (i32, i32) {
    %c0_i32 = arith.constant 0 : i32
    %c0_i32_0 = arith.constant 0 : i32
    %c0_i32_1 = arith.constant 0 : i32
    return %c0_i32, %c0_i32_0 : i32, i32
  }
  func.func @transform_12(%arg0: i32) -> (i32, i32) {
    %c0_i32 = arith.constant 0 : i32
    %c0_i32_0 = arith.constant 0 : i32
    %c0_i32_1 = arith.constant 0 : i32
    return %c0_i32, %c0_i32_0 : i32, i32
  }
  func.func @transform_13(%arg0: i32) -> (i32, i32) {
    %c0_i32 = arith.constant 0 : i32
    %c0_i32_0 = arith.constant 0 : i32
    %c0_i32_1 = arith.constant 0 : i32
    return %c0_i32, %c0_i32_0 : i32, i32
  }
  func.func @transform_14(%arg0: i32) -> (i32, i32) {
    %c0_i32 = arith.constant 0 : i32
    %c0_i32_0 = arith.constant 0 : i32
    return %arg0, %c0_i32 : i32, i32
  }
}

</mosaic_0001>

<bundles_post_ra>
// kernel: _lambda_.1
= control target key start
LH: loop header
LB: loop body
LE: loop exit
PB: predicated region body
PF: predicated region fallthrough
CT: control target
= control target key end

     0   :  { %s2717_s0 = inlined_call_operand.vmem [shape: bf16[64,512], index: 0, kind: input, shape index: {}]   ;;  %s2718_s1 = inlined_call_operand.vmem [shape: bf16[128,128], index: 1, kind: input, shape index: {}]   ;;  %s2719_s2 = inlined_call_operand.vmem [shape: bf16[512,64], index: 2, kind: input, shape index: {}]   ;;  %s2720_s3 = inlined_call_operand.vmem [shape: f32[1,64], index: 3, kind: input, shape index: {}]   ;;  %s2721_s4 = inlined_call_operand.vmem [shape: f32[4,64,32], index: 4, kind: input, shape index: {}]   ;;  %s2722_s5 = inlined_call_operand.vmem [shape: f32[1,32], index: 5, kind: input, shape index: {}]   ;;  %s2723_s6 = inlined_call_operand.vmem [shape: f32[4,32,16], index: 6, kind: input, shape index: {}]   ;;  %s2724_s7 = inlined_call_operand.vmem [shape: f32[1,16], index: 7, kind: input, shape index: {}]   ;;  %s2725_s8 = inlined_call_operand.vmem [shape: f32[16,16], index: 8, kind: input, shape index: {}]   ;;  %s2726_s9 = inlined_call_operand.vmem [shape: f32[1,16], index: 9, kind: input, shape index: {}]   ;;  %s2727_s10 = inlined_call_operand.vmem [shape: f32[16,8], index: 10, kind: input, shape index: {}]   ;;  %s2728_s11 = inlined_call_operand.vmem [shape: f32[1,8], index: 11, kind: input, shape index: {}]   ;;  %s2729_s12 = inlined_call_operand.vmem [shape: f32[8,3], index: 12, kind: input, shape index: {}]   ;;  %s2730_s13 = inlined_call_operand.vmem [shape: f32[1,3], index: 13, kind: input, shape index: {}]   ;;  %s2731_s14 = inlined_call_operand.hbm [shape: f32[2,3], index: 14, kind: output, shape index: {}]  }
   0x1   :  { %v2013_v0 = vld [vmem:[%s2718_s1 + $0x38] sm:$0xff]  ;;  %v2012_v4 = vld [vmem:[%s2718_s1 + $0x30] sm:$0xff]  ;;  %v2011_v8 = vld [vmem:[%s2718_s1 + $0x28] sm:$0xff] }
   0x2   :  { %v2025_v1 = vld [vmem:[%s2718_s1 + $0x38] sm:$0xff]  ;;  %144 = vmatpush.bf16.msra.mxu0 %v2013_v0  ;;  %v2024_v5 = vld [vmem:[%s2718_s1 + $0x30] sm:$0xff]  ;;  %v2023_v9 = vld [vmem:[%s2718_s1 + $0x28] sm:$0xff] }
   0x3   :  { %v2037_v2 = vld [vmem:[%s2718_s1 + $0x38] sm:$0xff]  ;;  %285 = vmatpush.bf16.msra.mxu1 %v2025_v1  ;;  %v2036_v6 = vld [vmem:[%s2718_s1 + $0x30] sm:$0xff]  ;;  %v2035_v10 = vld [vmem:[%s2718_s1 + $0x28] sm:$0xff] }
   0x4   :  { %v2049_v3 = vld [vmem:[%s2718_s1 + $0x38] sm:$0xff]  ;;  %426 = vmatpush.bf16.msra.mxu2 %v2037_v2  ;;  %v2048_v7 = vld [vmem:[%s2718_s1 + $0x30] sm:$0xff]  ;;  %v2047_v11 = vld [vmem:[%s2718_s1 + $0x28] sm:$0xff] }
   0x5   :  { %567 = vmatpush.bf16.msra.mxu3 %v2049_v3  ;;  %v2010_v12 = vld [vmem:[%s2718_s1 + $0x20] sm:$0xff]  ;;  %v2009_v16 = vld [vmem:[%s2718_s1 + $0x18] sm:$0xff]  ;;  %v2008_v20 = vld [vmem:[%s2718_s1 + $0x10] sm:$0xff] }
   0x6   :  { %145 = vmatpush.bf16.msra.mxu0 %v2012_v4  ;;  %v2022_v13 = vld [vmem:[%s2718_s1 + $0x20] sm:$0xff]  ;;  %v2021_v17 = vld [vmem:[%s2718_s1 + $0x18] sm:$0xff]  ;;  %v2020_v21 = vld [vmem:[%s2718_s1 + $0x10] sm:$0xff] }
   0x7   :  { %286 = vmatpush.bf16.msra.mxu1 %v2024_v5  ;;  %v2034_v14 = vld [vmem:[%s2718_s1 + $0x20] sm:$0xff]  ;;  %v2033_v18 = vld [vmem:[%s2718_s1 + $0x18] sm:$0xff] }
   0x8   :  { %427 = vmatpush.bf16.msra.mxu2 %v2036_v6  ;;  %v2046_v15 = vld [vmem:[%s2718_s1 + $0x20] sm:$0xff]  ;;  %v2045_v19 = vld [vmem:[%s2718_s1 + $0x18] sm:$0xff] }
   0x9   :  { %568 = vmatpush.bf16.msra.mxu3 %v2048_v7 }
   0xa   :  { %146 = vmatpush.bf16.msra.mxu0 %v2011_v8 }
   0xb   :  { %287 = vmatpush.bf16.msra.mxu1 %v2023_v9 }
   0xc   :  { %428 = vmatpush.bf16.msra.mxu2 %v2035_v10 }
   0xd   :  { %569 = vmatpush.bf16.msra.mxu3 %v2047_v11 }
   0xe   :  { %147 = vmatpush.bf16.msra.mxu0 %v2010_v12 }
   0xf   :  { %288 = vmatpush.bf16.msra.mxu1 %v2022_v13 }
  0x10   :  { %429 = vmatpush.bf16.msra.mxu2 %v2034_v14 }
  0x11   :  { %570 = vmatpush.bf16.msra.mxu3 %v2046_v15 }
  0x12   :  { %148 = vmatpush.bf16.msra.mxu0 %v2009_v16 }
  0x13   :  { %289 = vmatpush.bf16.msra.mxu1 %v2021_v17 }
  0x14   :  { %19 = vsyncpa [#allocation7], 0  ;;  %430 = vmatpush.bf16.msra.mxu2 %v2033_v18  ;;  %v2032_v22 = vld [vmem:[%s2718_s1 + $0x10] sm:$0xff]  ;;  %v2007_v24 = vld [vmem:[%s2718_s1 + $0x8] sm:$0xff]  ;;  %vm1133_vm1 = vcmask 523264   ;;  %vm1321_vm3 = vcmask 261120  }
  0x15   :  { %571 = vmatpush.bf16.msra.mxu3 %v2045_v19  ;;  %v2044_v23 = vld [vmem:[%s2718_s1 + $0x10] sm:$0xff]  ;;  %v2019_v25 = vld [vmem:[%s2718_s1 + $0x8] sm:$0xff]  ;;  %v2006_v28 = vld [vmem:[%s2718_s1] sm:$0xff]  ;;  %vm1451_vm4 = vcmask 125952   ;;  %vm1465_vm5 = vcmask 130048   ;;  %vm1525_vm6 = vcmask 64512  }
  0x16   :  { %149 = vmatpush.bf16.msra.mxu0 %v2008_v20  ;;  %v2031_v26 = vld [vmem:[%s2718_s1 + $0x8] sm:$0xff]  ;;  %v2018_v29 = vld [vmem:[%s2718_s1] sm:$0xff]  ;;  %v2002_v33 = vld [vmem:[%s2717_s0 + $0xc] sm:$0xf0]  ;;  %s2131_s27 = smov [#allocation6]   ;;  %s1558_s30 = sshll.u32 %s2731_s14, 4  ;;  %s1559_s30 = int_to_ptr.hbm [resolvable:$true] %s1558_s30 }
  0x17   :  { %290 = vmatpush.bf16.msra.mxu1 %v2020_v21  ;;  %v2043_v27 = vld [vmem:[%s2718_s1 + $0x8] sm:$0xff]  ;;  %v2030_v30 = vld [vmem:[%s2718_s1] sm:$0xff]  ;;  %v2014_v35 = vld [vmem:[%s2717_s0 + $0x10] sm:$0xf0]  ;;  %s1556_s28 = sshll.u32 %s2131_s27, 4  ;;  %vm1549_vm7 = vcmask 17408   ;;  %s1557_s28 = int_to_ptr.vmem [resolvable:$true] %s1556_s28 }
  0x18   :  { %431 = vmatpush.bf16.msra.mxu2 %v2032_v22  ;;  %v2042_v31 = vld [vmem:[%s2718_s1] sm:$0xff]  ;;  %v1665_v36 = vld [vmem:[%s2717_s0 + $0x8] sm:$0xf]  ;;  %v2026_v37 = vld [vmem:[%s2717_s0 + $0x14] sm:$0xf0] }
  0x19   :  { %572 = vmatpush.bf16.msra.mxu3 %v2044_v23  ;;  %v1569_v32 = vld [vmem:[%s2717_s0] sm:$0xf]  ;;  %v1617_v34 = vld [vmem:[%s2717_s0 + $0x4] sm:$0xf]  ;;  %v1713_v38 = vld [vmem:[%s2717_s0 + $0xc] sm:$0xf]  ;;  %v1666_v42 = vor.u32 %v2026_v37, %v1665_v36 }
  0x1a   :  { %150 = vmatpush.bf16.msra.mxu0 %v2007_v24  ;;  %v2038_v39 = vld [vmem:[%s2717_s0 + $0x18] sm:$0xf0]  ;;  %v1570_v40 = vor.u32 %v2002_v33, %v1569_v32  ;;  %v1618_v41 = vor.u32 %v2014_v35, %v1617_v34  ;;  %v1573_v44 = vld [vmem:[%s2717_s0 + $0x20] sm:$0xf]  ;;  %v2003_v45 = vld [vmem:[%s2717_s0 + $0x2c] sm:$0xf0] }
  0x1b   :  { %291 = vmatpush.bf16.msra.mxu1 %v2019_v25  ;;  %v1714_v43 = vor.u32 %v2038_v39, %v1713_v38  ;;  %v1621_v46 = vld [vmem:[%s2717_s0 + $0x24] sm:$0xf]  ;;  %v2015_v47 = vld [vmem:[%s2717_s0 + $0x30] sm:$0xf0]  ;;  %v1669_v48 = vld [vmem:[%s2717_s0 + $0x28] sm:$0xf]  ;;  %v1574_v52 = vor.u32 %v2003_v45, %v1573_v44 }
  0x1c   :  { %432 = vmatpush.bf16.msra.mxu2 %v2031_v26  ;;  %v2027_v49 = vld [vmem:[%s2717_s0 + $0x34] sm:$0xf0]  ;;  %v1717_v50 = vld [vmem:[%s2717_s0 + $0x2c] sm:$0xf]  ;;  %v2039_v51 = vld [vmem:[%s2717_s0 + $0x38] sm:$0xf0]  ;;  %v1622_v53 = vor.u32 %v2015_v47, %v1621_v46 }
  0x1d   :  { %573 = vmatpush.bf16.msra.mxu3 %v2043_v27  ;;  %v1670_v54 = vor.u32 %v2027_v49, %v1669_v48  ;;  %v1718_v55 = vor.u32 %v2039_v51, %v1717_v50  ;;  %v2089_v56 = vld [vmem:[%s2719_s2 + $0xb8] sm:$0xff]  ;;  %v2088_v60 = vld [vmem:[%s2719_s2 + $0xb0] sm:$0xff]  ;;  %v1577_v0 = vld [vmem:[%s2717_s0 + $0x40] sm:$0xf] }
  0x1e   :  { %151 = vmatpush.bf16.msra.mxu0 %v2006_v28  ;;  %v2073_v57 = vld [vmem:[%s2719_s2 + $0x38] sm:$0xff]  ;;  %v2072_v61 = vld [vmem:[%s2719_s2 + $0x30] sm:$0xff]  ;;  %v2087_v1 = vld [vmem:[%s2719_s2 + $0xa8] sm:$0xff] }
  0x1f   :  { %292 = vmatpush.bf16.msra.mxu1 %v2018_v29  ;;  %v2097_v58 = vld [vmem:[%s2719_s2 + $0xf8] sm:$0xff]  ;;  %v2096_v62 = vld [vmem:[%s2719_s2 + $0xf0] sm:$0xff]  ;;  %v2071_v2 = vld [vmem:[%s2719_s2 + $0x28] sm:$0xff] }
  0x20   :  { %433 = vmatpush.bf16.msra.mxu2 %v2030_v30  ;;  %v2081_v59 = vld [vmem:[%s2719_s2 + $0x78] sm:$0xff]  ;;  %v2080_v63 = vld [vmem:[%s2719_s2 + $0x70] sm:$0xff]  ;;  %v2095_v4 = vld [vmem:[%s2719_s2 + $0xe8] sm:$0xff] }
  0x21   :  { %574 = vmatpush.bf16.msra.mxu3 %v2042_v31  ;;  %152 = vmatmul.bf16.vlgmr.msra.gmra.mxu0 %v1570_v40  ;;  %v2004_v3 = vld [vmem:[%s2717_s0 + $0x4c] sm:$0xf0]  ;;  %v2079_v5 = vld [vmem:[%s2719_s2 + $0x68] sm:$0xff]  ;;  %v1625_v6 = vld [vmem:[%s2717_s0 + $0x44] sm:$0xf] }
  0x22   :  { %293 = vmatmul.bf16.vlgmr.msra.gmra.mxu1 %v1618_v41  ;;  %1009 = vmatpush.bf16.msrb.mxu0 %v2073_v57  ;;  %v2016_v7 = vld [vmem:[%s2717_s0 + $0x50] sm:$0xf0]  ;;  %v1673_v8 = vld [vmem:[%s2717_s0 + $0x48] sm:$0xf]  ;;  %v2028_v9 = vld [vmem:[%s2717_s0 + $0x54] sm:$0xf0]  ;;  %v1578_v14 = vor.u32 %v2004_v3, %v1577_v0 }
  0x23   :  { %434 = vmatmul.bf16.vlgmr.msra.gmra.mxu2 %v1666_v42  ;;  %1038 = vmatpush.bf16.msrb.mxu1 %v2081_v59  ;;  %v1721_v10 = vld [vmem:[%s2717_s0 + $0x4c] sm:$0xf]  ;;  %v2040_v11 = vld [vmem:[%s2717_s0 + $0x58] sm:$0xf0]  ;;  %v2086_v12 = vld [vmem:[%s2719_s2 + $0xa0] sm:$0xff]  ;;  %v1626_v15 = vor.u32 %v2016_v7, %v1625_v6  ;;  %v1674_v16 = vor.u32 %v2028_v9, %v1673_v8 }
  0x24   :  { %575 = vmatmul.bf16.vlgmr.msra.gmra.mxu3 %v1714_v43  ;;  %1067 = vmatpush.bf16.msrb.mxu2 %v2089_v56  ;;  %v2070_v13 = vld [vmem:[%s2719_s2 + $0x20] sm:$0xff]  ;;  %v1722_v17 = vor.u32 %v2040_v11, %v1721_v10  ;;  %v2085_v20 = vld [vmem:[%s2719_s2 + $0x98] sm:$0xff]  ;;  %v2005_v25 = vld [vmem:[%s2717_s0 + $0x6c] sm:$0xf0] }
  0x25   :  { %1096 = vmatpush.bf16.msrb.mxu3 %v2097_v58  ;;  %v2094_v18 = vld [vmem:[%s2719_s2 + $0xe0] sm:$0xff]  ;;  %v2069_v21 = vld [vmem:[%s2719_s2 + $0x18] sm:$0xff]  ;;  %v2017_v27 = vld [vmem:[%s2717_s0 + $0x70] sm:$0xf0] }
  0x26   :  { %1010 = vmatpush.bf16.msrb.mxu0 %v2072_v61  ;;  %v2078_v19 = vld [vmem:[%s2719_s2 + $0x60] sm:$0xff]  ;;  %v2093_v22 = vld [vmem:[%s2719_s2 + $0xd8] sm:$0xff]  ;;  %v1677_v28 = vld [vmem:[%s2717_s0 + $0x68] sm:$0xf] }
  0x27   :  { %1039 = vmatpush.bf16.msrb.mxu1 %v2080_v63  ;;  %v2077_v23 = vld [vmem:[%s2719_s2 + $0x58] sm:$0xff]  ;;  %v1581_v24 = vld [vmem:[%s2717_s0 + $0x60] sm:$0xf]  ;;  %v1629_v26 = vld [vmem:[%s2717_s0 + $0x64] sm:$0xf] }
  0x28   :  { %1068 = vmatpush.bf16.msrb.mxu2 %v2088_v60  ;;  %v2029_v29 = vld [vmem:[%s2717_s0 + $0x74] sm:$0xf0]  ;;  %v1725_v30 = vld [vmem:[%s2717_s0 + $0x6c] sm:$0xf]  ;;  %v2041_v31 = vld [vmem:[%s2717_s0 + $0x78] sm:$0xf0]  ;;  %v1582_v32 = vor.u32 %v2005_v25, %v1581_v24  ;;  %v1630_v33 = vor.u32 %v2017_v27, %v1629_v26 }
  0x29   :  { %1097 = vmatpush.bf16.msrb.mxu3 %v2096_v62  ;;  %v1678_v34 = vor.u32 %v2029_v29, %v1677_v28  ;;  %v1726_v35 = vor.u32 %v2041_v31, %v1725_v30  ;;  %v2084_v36 = vld [vmem:[%s2719_s2 + $0x90] sm:$0xff]  ;;  %v2083_v40 = vld [vmem:[%s2719_s2 + $0x88] sm:$0xff]  ;;  %v2066_v44 = vld [vmem:[%s2719_s2] sm:$0xff] }
  0x2a   :  { %1011 = vmatpush.bf16.msrb.mxu0 %v2071_v2  ;;  %v2068_v37 = vld [vmem:[%s2719_s2 + $0x10] sm:$0xff]  ;;  %v2067_v41 = vld [vmem:[%s2719_s2 + $0x8] sm:$0xff]  ;;  %v2074_v45 = vld [vmem:[%s2719_s2 + $0x40] sm:$0xff] }
  0x2b   :  { %1040 = vmatpush.bf16.msrb.mxu1 %v2079_v5  ;;  %v2092_v38 = vld [vmem:[%s2719_s2 + $0xd0] sm:$0xff]  ;;  %v2091_v42 = vld [vmem:[%s2719_s2 + $0xc8] sm:$0xff]  ;;  %v2082_v46 = vld [vmem:[%s2719_s2 + $0x80] sm:$0xff] }
  0x2c   :  { %1069 = vmatpush.bf16.msrb.mxu2 %v2087_v1  ;;  %v2076_v39 = vld [vmem:[%s2719_s2 + $0x50] sm:$0xff]  ;;  %v2075_v43 = vld [vmem:[%s2719_s2 + $0x48] sm:$0xff]  ;;  %v2090_v47 = vld [vmem:[%s2719_s2 + $0xc0] sm:$0xff] }
  0x2d   :  { %1098 = vmatpush.bf16.msrb.mxu3 %v2095_v4 }
  0x2e   :  { %1012 = vmatpush.bf16.msrb.mxu0 %v2070_v13 }
  0x2f   :  { %1041 = vmatpush.bf16.msrb.mxu1 %v2078_v19 }
  0x30   :  { %1070 = vmatpush.bf16.msrb.mxu2 %v2086_v12 }
  0x31   :  { %157 = vmatmul.bf16.gmra.mxu0 %v1574_v52  ;;  %1099 = vmatpush.bf16.msrb.mxu3 %v2094_v18 }
  0x32   :  { %298 = vmatmul.bf16.gmra.mxu1 %v1622_v53  ;;  %1013 = vmatpush.bf16.msrb.mxu0 %v2069_v21 }
  0x33   :  { %439 = vmatmul.bf16.gmra.mxu2 %v1670_v54  ;;  %1042 = vmatpush.bf16.msrb.mxu1 %v2077_v23 }
  0x34   :  { %580 = vmatmul.bf16.gmra.mxu3 %v1718_v55  ;;  %1071 = vmatpush.bf16.msrb.mxu2 %v2085_v20 }
  0x35   :  { %1100 = vmatpush.bf16.msrb.mxu3 %v2093_v22 }
  0x36   :  { %1014 = vmatpush.bf16.msrb.mxu0 %v2068_v37 }
  0x37   :  { %1043 = vmatpush.bf16.msrb.mxu1 %v2076_v39 }
  0x38   :  { %1072 = vmatpush.bf16.msrb.mxu2 %v2084_v36 }
  0x39   :  { %1101 = vmatpush.bf16.msrb.mxu3 %v2092_v38 }
  0x3a   :  { %1015 = vmatpush.bf16.msrb.mxu0 %v2067_v41 }
  0x3b   :  { %1044 = vmatpush.bf16.msrb.mxu1 %v2075_v43 }
  0x3c   :  { %1073 = vmatpush.bf16.msrb.mxu2 %v2083_v40 }
  0x3d   :  { %1102 = vmatpush.bf16.msrb.mxu3 %v2091_v42 }
  0x3e   :  { %1016 = vmatpush.bf16.msrb.mxu0 %v2066_v44 }
  0x3f   :  { %1045 = vmatpush.bf16.msrb.mxu1 %v2074_v45 }
  0x40   :  { %1074 = vmatpush.bf16.msrb.mxu2 %v2082_v46 }
  0x41   :  { %162 = vmatmul.bf16.gmra.mxu0 %v1578_v14  ;;  %1103 = vmatpush.bf16.msrb.mxu3 %v2090_v47 }
  0x42   :  { %303 = vmatmul.bf16.gmra.mxu1 %v1626_v15 }
  0x43   :  { %444 = vmatmul.bf16.gmra.mxu2 %v1674_v16 }
  0x44   :  { %585 = vmatmul.bf16.gmra.mxu3 %v1722_v17 }
  0x51   :  { %167 = vmatmul.bf16.gmra.mxu0 %v1582_v32 }
  0x52   :  { %308 = vmatmul.bf16.gmra.mxu1 %v1630_v33 }
  0x53   :  { %449 = vmatmul.bf16.gmra.mxu2 %v1678_v34 }
  0x54   :  { %590 = vmatmul.bf16.gmra.mxu3 %v1726_v35 }
  0x9e   :  { %v153_v48 = vpop.f32.mrf.mxu0 }
  0x9f   :  { %v294_v49 = vpop.f32.mrf.mxu1  ;;  %v173_v50 = vpack.c.bf16 %v153_v48, %v153_v48 }
  0xa0   :  { %v314_v51 = vpack.c.bf16 %v294_v49, %v294_v49 }
  0xa1   :  { %181 = vst [vmem:[#allocation2] sm:$0xf] %v173_v50 }
  0xa2   :  { %322 = vst [vmem:[#allocation2 + $0x4] sm:$0xf] %v314_v51 }
  0xa6   :  { %v435_v52 = vpop.f32.mrf.mxu2  ;;  %v155_v56 = vpop.f32.mrf.mxu0 }
  0xa7   :  { %v576_v53 = vpop.f32.mrf.mxu3  ;;  %v455_v54 = vpack.c.bf16 %v435_v52, %v435_v52  ;;  %v296_v57 = vpop.f32.mrf.mxu1  ;;  %v174_v58 = vpack.c.bf16 %v155_v56, %v155_v56 }
  0xa8   :  { %v596_v55 = vpack.c.bf16 %v576_v53, %v576_v53  ;;  %v315_v59 = vpack.c.bf16 %v296_v57, %v296_v57  ;;  %v1761_v4 = vld [vmem:[#allocation2] sm:$0xf] }
  0xa9   :  { %463 = vst [vmem:[#allocation2 + $0x8] sm:$0xf] %v455_v54  ;;  %v2050_v5 = vld [vmem:[#allocation2 + $0x4] sm:$0xf] }
  0xaa   :  { %604 = vst [vmem:[#allocation2 + $0xc] sm:$0xf] %v596_v55 }
  0xab   :  { %182 = vst [vmem:[#allocation2 + $0x10] sm:$0xf] %v174_v58 }
  0xac   :  { %323 = vst [vmem:[#allocation2 + $0x14] sm:$0xf] %v315_v59 }
  0xae   :  { %v437_v60 = vpop.f32.mrf.mxu2  ;;  %v158_v0 = vpop.f32.mrf.mxu0 }
  0xaf   :  { %v578_v61 = vpop.f32.mrf.mxu3  ;;  %v456_v62 = vpack.c.bf16 %v437_v60, %v437_v60  ;;  %v299_v1 = vpop.f32.mrf.mxu1  ;;  %v175_v2 = vpack.c.bf16 %v158_v0, %v158_v0 }
  0xb0   :  { %v597_v63 = vpack.c.bf16 %v578_v61, %v578_v61  ;;  %v316_v3 = vpack.c.bf16 %v299_v1, %v299_v1  ;;  %v1769_v18 = vld [vmem:[#allocation2 + $0x8] sm:$0xf] }
  0xb1   :  { %464 = vst [vmem:[#allocation2 + $0x18] sm:$0xf] %v456_v62  ;;  %v2051_v21 = vld [vmem:[#allocation2 + $0xc] sm:$0xf] }
  0xb2   :  { %605 = vst [vmem:[#allocation2 + $0x1c] sm:$0xf] %v597_v63  ;;  %v2052_v6 = vld [vmem:[#allocation2 + $0xc] sm:$0xf0] }
  0xb3   :  { %183 = vst [vmem:[#allocation2 + $0x20] sm:$0xf] %v175_v2  ;;  %v1762_v7 = vor.u32 %v2052_v6, %v1761_v4  ;;  %v1763_v8 = vld [vmem:[#allocation2 + $0x10] sm:$0xf0] }
  0xb4   :  { %324 = vst [vmem:[#allocation2 + $0x24] sm:$0xf] %v316_v3  ;;  %v1766_v9 = vor.u32 %v2050_v5, %v1763_v8 }
  0xb5   :  { %1017 = vmatmul.bf16.vlgmr.msrb.gmra.mxu0 %v1762_v7 }
  0xb6   :  { %1046 = vmatmul.bf16.vlgmr.msrb.gmra.mxu1 %v1766_v9  ;;  %v440_v10 = vpop.f32.mrf.mxu2  ;;  %v160_v14 = vpop.f32.mrf.mxu0 }
  0xb7   :  { %v581_v11 = vpop.f32.mrf.mxu3  ;;  %v457_v12 = vpack.c.bf16 %v440_v10, %v440_v10  ;;  %v301_v15 = vpop.f32.mrf.mxu1  ;;  %v176_v16 = vpack.c.bf16 %v160_v14, %v160_v14 }
  0xb8   :  { %v598_v13 = vpack.c.bf16 %v581_v11, %v581_v11  ;;  %v317_v17 = vpack.c.bf16 %v301_v15, %v301_v15  ;;  %v2053_v19 = vld [vmem:[#allocation2 + $0x14] sm:$0xf0] }
  0xb9   :  { %465 = vst [vmem:[#allocation2 + $0x28] sm:$0xf] %v457_v12  ;;  %v1770_v20 = vor.u32 %v2053_v19, %v1769_v18  ;;  %v1771_v22 = vld [vmem:[#allocation2 + $0x18] sm:$0xf0] }
  0xba   :  { %606 = vst [vmem:[#allocation2 + $0x2c] sm:$0xf] %v598_v13  ;;  %v1774_v23 = vor.u32 %v2051_v21, %v1771_v22  ;;  %v1777_v32 = vld [vmem:[#allocation2 + $0x20] sm:$0xf] }
  0xbb   :  { %184 = vst [vmem:[#allocation2 + $0x30] sm:$0xf] %v176_v16  ;;  %1075 = vmatmul.bf16.vlgmr.msrb.gmra.mxu2 %v1770_v20  ;;  %v2054_v33 = vld [vmem:[#allocation2 + $0x24] sm:$0xf] }
  0xbc   :  { %325 = vst [vmem:[#allocation2 + $0x34] sm:$0xf] %v317_v17  ;;  %1104 = vmatmul.bf16.vlgmr.msrb.gmra.mxu3 %v1774_v23 }
  0xbe   :  { %v442_v24 = vpop.f32.mrf.mxu2  ;;  %v163_v28 = vpop.f32.mrf.mxu0 }
  0xbf   :  { %v583_v25 = vpop.f32.mrf.mxu3  ;;  %v458_v26 = vpack.c.bf16 %v442_v24, %v442_v24  ;;  %v304_v29 = vpop.f32.mrf.mxu1  ;;  %v177_v30 = vpack.c.bf16 %v163_v28, %v163_v28 }
  0xc0   :  { %v599_v27 = vpack.c.bf16 %v583_v25, %v583_v25  ;;  %v318_v31 = vpack.c.bf16 %v304_v29, %v304_v29  ;;  %v1785_v46 = vld [vmem:[#allocation2 + $0x28] sm:$0xf] }
  0xc1   :  { %466 = vst [vmem:[#allocation2 + $0x38] sm:$0xf] %v458_v26  ;;  %v2055_v49 = vld [vmem:[#allocation2 + $0x2c] sm:$0xf] }
  0xc2   :  { %607 = vst [vmem:[#allocation2 + $0x3c] sm:$0xf] %v599_v27  ;;  %v2056_v34 = vld [vmem:[#allocation2 + $0x2c] sm:$0xf0] }
  0xc3   :  { %185 = vst [vmem:[#allocation2 + $0x40] sm:$0xf] %v177_v30  ;;  %v1778_v35 = vor.u32 %v2056_v34, %v1777_v32  ;;  %v1779_v36 = vld [vmem:[#allocation2 + $0x30] sm:$0xf0]  ;;  %v1970_v32 = vld [vmem:[%s2721_s4 + $0xb8] sm:$0xff] }
  0xc4   :  { %326 = vst [vmem:[#allocation2 + $0x44] sm:$0xf] %v318_v31  ;;  %v1782_v37 = vor.u32 %v2054_v33, %v1779_v36  ;;  %v1157_v33 = vld [vmem:[%s2721_s4 + $0x38] sm:$0xff]  ;;  %1260 = vmatpush.msra.mxu2 %v1970_v32  ;;  %v1969_v36 = vld [vmem:[%s2721_s4 + $0xb0] sm:$0xff] }
  0xc5   :  { %1022 = vmatmul.bf16.gmra.mxu0 %v1778_v35  ;;  %v1980_v34 = vld [vmem:[%s2721_s4 + $0xf8] sm:$0xff] }
  0xc6   :  { %1051 = vmatmul.bf16.gmra.mxu1 %v1782_v37  ;;  %v445_v38 = vpop.f32.mrf.mxu2  ;;  %v165_v42 = vpop.f32.mrf.mxu0  ;;  %1172 = vmatpush.msra.mxu0 %v1157_v33  ;;  %v1960_v35 = vld [vmem:[%s2721_s4 + $0x78] sm:$0xff]  ;;  %v1156_v37 = vld [vmem:[%s2721_s4 + $0x30] sm:$0xff] }
  0xc7   :  { %v586_v39 = vpop.f32.mrf.mxu3  ;;  %v459_v40 = vpack.c.bf16 %v445_v38, %v445_v38  ;;  %v306_v43 = vpop.f32.mrf.mxu1  ;;  %v178_v44 = vpack.c.bf16 %v165_v42, %v165_v42  ;;  %1304 = vmatpush.msra.mxu3 %v1980_v34  ;;  %1216 = vmatpush.msra.mxu1 %v1960_v35  ;;  %v1979_v38 = vld [vmem:[%s2721_s4 + $0xf0] sm:$0xff]  ;;  %v1978_v42 = vld [vmem:[%s2721_s4 + $0xe8] sm:$0xff] }
  0xc8   :  { %v600_v41 = vpack.c.bf16 %v586_v39, %v586_v39  ;;  %v319_v45 = vpack.c.bf16 %v306_v43, %v306_v43  ;;  %v2057_v47 = vld [vmem:[#allocation2 + $0x34] sm:$0xf0]  ;;  %1261 = vmatpush.msra.mxu2 %v1969_v36  ;;  %1173 = vmatpush.msra.mxu0 %v1156_v37  ;;  %v1959_v39 = vld [vmem:[%s2721_s4 + $0x70] sm:$0xff] }
  0xc9   :  { %467 = vst [vmem:[#allocation2 + $0x48] sm:$0xf] %v459_v40  ;;  %v1786_v48 = vor.u32 %v2057_v47, %v1785_v46  ;;  %v1787_v50 = vld [vmem:[#allocation2 + $0x38] sm:$0xf0]  ;;  %1305 = vmatpush.msra.mxu3 %v1979_v38  ;;  %1217 = vmatpush.msra.mxu1 %v1959_v39  ;;  %v1968_v40 = vld [vmem:[%s2721_s4 + $0xa8] sm:$0xff]  ;;  %v692_v47 = vlaneseq }
  0xca   :  { %608 = vst [vmem:[#allocation2 + $0x4c] sm:$0xf] %v600_v41  ;;  %v1790_v51 = vor.u32 %v2055_v49, %v1787_v50  ;;  %v1793_v60 = vld [vmem:[#allocation2 + $0x40] sm:$0xf]  ;;  %v1155_v41 = vld [vmem:[%s2721_s4 + $0x28] sm:$0xff]  ;;  %1262 = vmatpush.msra.mxu2 %v1968_v40 }
  0xcb   :  { %186 = vst [vmem:[#allocation2 + $0x50] sm:$0xf] %v178_v44  ;;  %1080 = vmatmul.bf16.gmra.mxu2 %v1786_v48  ;;  %v2058_v61 = vld [vmem:[#allocation2 + $0x44] sm:$0xf]  ;;  %1174 = vmatpush.msra.mxu0 %v1155_v41  ;;  %v2534_v46 = vld [vmem:[%s2720_s3] ss:$0 sm:$0xff] }
  0xcc   :  { %327 = vst [vmem:[#allocation2 + $0x54] sm:$0xf] %v319_v45  ;;  %1109 = vmatmul.bf16.gmra.mxu3 %v1790_v51  ;;  %v1958_v45 = vld [vmem:[%s2721_s4 + $0x68] sm:$0xff]  ;;  %v1967_v48 = vld [vmem:[%s2721_s4 + $0xa0] sm:$0xff]  ;;  %v2545_v51 = vshrl.u32 %v692_v47, 7 }
  0xcd   :  { %1306 = vmatpush.msra.mxu3 %v1978_v42  ;;  %1218 = vmatpush.msra.mxu1 %v1958_v45  ;;  %v1154_v49 = vld [vmem:[%s2721_s4 + $0x20] sm:$0xff] }
  0xce   :  { %v447_v52 = vpop.f32.mrf.mxu2  ;;  %v168_v56 = vpop.f32.mrf.mxu0  ;;  %v1977_v50 = vld [vmem:[%s2721_s4 + $0xe0] sm:$0xff]  ;;  %1263 = vmatpush.msra.mxu2 %v1967_v48  ;;  %1175 = vmatpush.msra.mxu0 %v1154_v49  ;;  %v697_v39 = vadd.s32 32, %v2545_v51 }
  0xcf   :  { %v588_v53 = vpop.f32.mrf.mxu3  ;;  %v460_v54 = vpack.c.bf16 %v447_v52, %v447_v52  ;;  %v309_v57 = vpop.f32.mrf.mxu1  ;;  %v179_v58 = vpack.c.bf16 %v168_v56, %v168_v56  ;;  %1307 = vmatpush.msra.mxu3 %v1977_v50  ;;  %v701_v56 = vand.u32 31, %v2545_v51 }
  0xd0   :  { %v601_v55 = vpack.c.bf16 %v588_v53, %v588_v53  ;;  %v320_v59 = vpack.c.bf16 %v309_v57, %v309_v57  ;;  %v1801_v10 = vld [vmem:[#allocation2 + $0x48] sm:$0xf]  ;;  %v1966_v57 = vld [vmem:[%s2721_s4 + $0x98] sm:$0xff] }
  0xd1   :  { %468 = vst [vmem:[#allocation2 + $0x58] sm:$0xf] %v460_v54  ;;  %v2059_v13 = vld [vmem:[#allocation2 + $0x4c] sm:$0xf]  ;;  %v1957_v54 = vld [vmem:[%s2721_s4 + $0x60] sm:$0xff]  ;;  %1264 = vmatpush.msra.mxu2 %v1966_v57  ;;  %vm2576_vm0 = vcmp.ge.s32.totalorder %v701_v56, 2 }
  0xd2   :  { %609 = vst [vmem:[#allocation2 + $0x5c] sm:$0xf] %v601_v55  ;;  %v2060_v62 = vld [vmem:[#allocation2 + $0x4c] sm:$0xf0]  ;;  %1219 = vmatpush.msra.mxu1 %v1957_v54 }
  0xd3   :  { %187 = vst [vmem:[#allocation2 + $0x60] sm:$0xf] %v179_v58  ;;  %v1794_v63 = vor.u32 %v2060_v62, %v1793_v60  ;;  %v1795_v0 = vld [vmem:[#allocation2 + $0x50] sm:$0xf0]  ;;  %v1153_v58 = vld [vmem:[%s2721_s4 + $0x18] sm:$0xff] }
  0xd4   :  { %328 = vst [vmem:[#allocation2 + $0x64] sm:$0xf] %v320_v59  ;;  %v1798_v1 = vor.u32 %v2058_v61, %v1795_v0  ;;  %v1956_v59 = vld [vmem:[%s2721_s4 + $0x58] sm:$0xff]  ;;  %1176 = vmatpush.msra.mxu0 %v1153_v58  ;;  %v1955_v0 = vld [vmem:[%s2721_s4 + $0x50] sm:$0xff] }
  0xd5   :  { %1027 = vmatmul.bf16.gmra.mxu0 %v1794_v63  ;;  %v1976_v61 = vld [vmem:[%s2721_s4 + $0xd8] sm:$0xff]  ;;  %1220 = vmatpush.msra.mxu1 %v1956_v59  ;;  %v1152_v63 = vld [vmem:[%s2721_s4 + $0x10] sm:$0xff] }
  0xd6   :  { %1056 = vmatmul.bf16.gmra.mxu1 %v1798_v1  ;;  %v450_v2 = vpop.f32.mrf.mxu2  ;;  %v170_v6 = vpop.f32.mrf.mxu0  ;;  %1308 = vmatpush.msra.mxu3 %v1976_v61  ;;  %v1965_v1 = vld [vmem:[%s2721_s4 + $0x90] sm:$0xff] }
  0xd7   :  { %v591_v3 = vpop.f32.mrf.mxu3  ;;  %v461_v4 = vpack.c.bf16 %v450_v2, %v450_v2  ;;  %v311_v7 = vpop.f32.mrf.mxu1  ;;  %v180_v8 = vpack.c.bf16 %v170_v6, %v170_v6  ;;  %1177 = vmatpush.msra.mxu0 %v1152_v63  ;;  %1265 = vmatpush.msra.mxu2 %v1965_v1  ;;  %v1151_v6 = vld [vmem:[%s2721_s4 + $0x8] sm:$0xff] }
  0xd8   :  { %v602_v5 = vpack.c.bf16 %v591_v3, %v591_v3  ;;  %v321_v9 = vpack.c.bf16 %v311_v7, %v311_v7  ;;  %v2061_v11 = vld [vmem:[#allocation2 + $0x54] sm:$0xf0]  ;;  %1221 = vmatpush.msra.mxu1 %v1955_v0  ;;  %v1954_v7 = vld [vmem:[%s2721_s4 + $0x48] sm:$0xff] }
  0xd9   :  { %469 = vst [vmem:[#allocation2 + $0x68] sm:$0xf] %v461_v4  ;;  %v1802_v12 = vor.u32 %v2061_v11, %v1801_v10  ;;  %v1803_v14 = vld [vmem:[#allocation2 + $0x58] sm:$0xf0]  ;;  %v1975_v4 = vld [vmem:[%s2721_s4 + $0xd0] sm:$0xff]  ;;  %1178 = vmatpush.msra.mxu0 %v1151_v6  ;;  %v1974_v11 = vld [vmem:[%s2721_s4 + $0xc8] sm:$0xff] }
  0xda   :  { %610 = vst [vmem:[#allocation2 + $0x6c] sm:$0xf] %v602_v5  ;;  %v1806_v15 = vor.u32 %v2059_v13, %v1803_v14  ;;  %v1809_v20 = vld [vmem:[#allocation2 + $0x60] sm:$0xf]  ;;  %1309 = vmatpush.msra.mxu3 %v1975_v4  ;;  %1222 = vmatpush.msra.mxu1 %v1954_v7 }
  0xdb   :  { %188 = vst [vmem:[#allocation2 + $0x70] sm:$0xf] %v180_v8  ;;  %1085 = vmatmul.bf16.gmra.mxu2 %v1802_v12  ;;  %v2062_v21 = vld [vmem:[#allocation2 + $0x64] sm:$0xf]  ;;  %v1964_v8 = vld [vmem:[%s2721_s4 + $0x88] sm:$0xff] }
  0xdc   :  { %329 = vst [vmem:[#allocation2 + $0x74] sm:$0xf] %v321_v9  ;;  %1114 = vmatmul.bf16.gmra.mxu3 %v1806_v15  ;;  %1266 = vmatpush.msra.mxu2 %v1964_v8  ;;  %v1150_v13 = vld [vmem:[%s2721_s4] sm:$0xff] }
  0xdd   :  { %1310 = vmatpush.msra.mxu3 %v1974_v11  ;;  %v1953_v14 = vld [vmem:[%s2721_s4 + $0x40] sm:$0xff]  ;;  %1179 = vmatpush.msra.mxu0 %v1150_v13 }
  0xde   :  { %v452_v16 = vpop.f32.mrf.mxu2  ;;  %v1963_v15 = vld [vmem:[%s2721_s4 + $0x80] sm:$0xff]  ;;  %1223 = vmatpush.msra.mxu1 %v1953_v14 }
  0xdf   :  { %v593_v17 = vpop.f32.mrf.mxu3  ;;  %v462_v18 = vpack.c.bf16 %v452_v16, %v452_v16  ;;  %1267 = vmatpush.msra.mxu2 %v1963_v15 }
  0xe0   :  { %v603_v19 = vpack.c.bf16 %v593_v17, %v593_v17  ;;  %v1817_v26 = vld [vmem:[#allocation2 + $0x68] sm:$0xf] }
  0xe1   :  { %470 = vst [vmem:[#allocation2 + $0x78] sm:$0xf] %v462_v18  ;;  %v2063_v29 = vld [vmem:[#allocation2 + $0x6c] sm:$0xf]  ;;  %v1973_v18 = vld [vmem:[%s2721_s4 + $0xc0] sm:$0xff] }
  0xe2   :  { %611 = vst [vmem:[#allocation2 + $0x7c] sm:$0xf] %v603_v19  ;;  %v2064_v22 = vld [vmem:[#allocation2 + $0x6c] sm:$0xf0]  ;;  %1311 = vmatpush.msra.mxu3 %v1973_v18 }
  0xe3   :  { %v1810_v23 = vor.u32 %v2064_v22, %v1809_v20  ;;  %v1811_v24 = vld [vmem:[#allocation2 + $0x70] sm:$0xf0] }
  0xe4   :  { %v1814_v25 = vor.u32 %v2062_v21, %v1811_v24 }
  0xe5   :  { %1032 = vmatmul.bf16.gmra.mxu0 %v1810_v23 }
  0xe6   :  { %1061 = vmatmul.bf16.gmra.mxu1 %v1814_v25 }
  0xe8   :  { %v2065_v27 = vld [vmem:[#allocation2 + $0x74] sm:$0xf0] }
  0xe9   :  { %v1818_v28 = vor.u32 %v2065_v27, %v1817_v26  ;;  %v1819_v30 = vld [vmem:[#allocation2 + $0x78] sm:$0xf0] }
  0xea   :  { %v1822_v31 = vor.u32 %v2063_v29, %v1819_v30 }
  0xeb   :  { %1090 = vmatmul.bf16.gmra.mxu2 %v1818_v28 }
  0xec   :  { %1119 = vmatmul.bf16.gmra.mxu3 %v1822_v31 }
 0x132   :  { %v1018_v43 = vpop.f32.mrf.mxu0 }
 0x133   :  { %v1047_v44 = vpop.f32.mrf.mxu1  ;;  %v1019_v52 = vadd.f32 %v2534_v46, %v1018_v43  ;;  %v705_v43 = vand.u32 31, %v697_v39  ;;  %v1330_v39 = vld [vmem:[%s2723_s6] sm:$0xff] }
 0x135   :  { %v1048_v60 = vadd.f32 %v1047_v44, %v1019_v52  ;;  %vm713_vm2 = vcmp.ge.s32.totalorder %v705_v43, 2 }
 0x13a   :  { %v1020_v53 = vpop.f32.mrf.mxu0 }
 0x13b   :  { %v1049_v55 = vpop.f32.mrf.mxu1  ;;  %v1021_v9 = vadd.f32 %v2534_v46, %v1020_v53 }
 0x13d   :  { %v1050_v19 = vadd.f32 %v1049_v55, %v1021_v9 }
 0x13e   :  { %v1076_v62 = vpop.f32.mrf.mxu2 }
 0x13f   :  { %v1077_v2 = vadd.f32 %v1076_v62, %v1048_v60  ;;  %v1105_v3 = vpop.f32.mrf.mxu3 }
 0x141   :  { %v1106_v10 = vadd.f32 %v1105_v3, %v1077_v2 }
 0x142   :  { %v1023_v12 = vpop.f32.mrf.mxu0 }
 0x143   :  { %v1125_v16 = vsel %vm2576_vm0, %v1106_v10, 0.0  ;;  %v1052_v17 = vpop.f32.mrf.mxu1  ;;  %v1024_v23 = vadd.f32 %v2534_v46, %v1023_v12 }
 0x144   :  { %1134 = vst.msk [vmem:[#allocation3] sm:$0xff] %vm1133_vm1, %v1125_v16 }
 0x145   :  { %v1053_v27 = vadd.f32 %v1052_v17, %v1024_v23 }
 0x146   :  { %v1078_v20 = vpop.f32.mrf.mxu2 }
 0x147   :  { %v1079_v21 = vadd.f32 %v1078_v20, %v1050_v19  ;;  %v1107_v22 = vpop.f32.mrf.mxu3  ;;  %v1992_v20 = vld [vmem:[%s2723_s6 + $0x58] sm:$0xff] }
 0x148   :  { %1411 = vmatpush.msrb.mxu2 %v1992_v20 }
 0x149   :  { %v1108_v24 = vadd.f32 %v1107_v22, %v1079_v21  ;;  %v1333_v21 = vld [vmem:[%s2723_s6 + $0x18] sm:$0xff] }
 0x14a   :  { %v1025_v25 = vpop.f32.mrf.mxu0  ;;  %v1997_v22 = vld [vmem:[%s2723_s6 + $0x78] sm:$0xff]  ;;  %1349 = vmatpush.msrb.mxu0 %v1333_v21 }
 0x14b   :  { %1135 = vst.msk [vmem:[#allocation3 + $0x8] sm:$0xff] %vm1133_vm1, %v1108_v24  ;;  %v1054_v26 = vpop.f32.mrf.mxu1  ;;  %v1026_v31 = vadd.f32 %v2534_v46, %v1025_v25  ;;  %1442 = vmatpush.msrb.mxu3 %v1997_v22 }
 0x14d   :  { %v1055_v34 = vadd.f32 %v1054_v26, %v1026_v31  ;;  %v1332_v31 = vld [vmem:[%s2723_s6 + $0x10] sm:$0xff] }
 0x14e   :  { %v1081_v28 = vpop.f32.mrf.mxu2  ;;  %1350 = vmatpush.msrb.mxu0 %v1332_v31 }
 0x14f   :  { %v1082_v29 = vadd.f32 %v1081_v28, %v1053_v27  ;;  %v1110_v30 = vpop.f32.mrf.mxu3 }
 0x151   :  { %v1111_v32 = vadd.f32 %v1110_v30, %v1082_v29  ;;  %v1987_v29 = vld [vmem:[%s2723_s6 + $0x38] sm:$0xff]  ;;  %v1991_v30 = vld [vmem:[%s2723_s6 + $0x50] sm:$0xff] }
 0x152   :  { %v1028_v33 = vpop.f32.mrf.mxu0  ;;  %1380 = vmatpush.msrb.mxu1 %v1987_v29  ;;  %1412 = vmatpush.msrb.mxu2 %v1991_v30 }
 0x153   :  { %1136 = vst.msk [vmem:[#allocation3 + $0x10] sm:$0xff] %vm1133_vm1, %v1111_v32  ;;  %v1057_v35 = vpop.f32.mrf.mxu1  ;;  %v1029_v40 = vadd.f32 %v2534_v46, %v1028_v33  ;;  %v1996_v32 = vld [vmem:[%s2723_s6 + $0x70] sm:$0xff] }
 0x154   :  { %v1986_v33 = vld [vmem:[%s2723_s6 + $0x30] sm:$0xff]  ;;  %1443 = vmatpush.msrb.mxu3 %v1996_v32 }
 0x155   :  { %v1058_v44 = vadd.f32 %v1057_v35, %v1029_v40  ;;  %v1331_v35 = vld [vmem:[%s2723_s6 + $0x8] sm:$0xff]  ;;  %1381 = vmatpush.msrb.mxu1 %v1986_v33  ;;  %v1994_v40 = vld [vmem:[%s2723_s6 + $0x60] sm:$0xff] }
 0x156   :  { %v1083_v36 = vpop.f32.mrf.mxu2  ;;  %1351 = vmatpush.msrb.mxu0 %v1331_v35 }
 0x157   :  { %v1084_v37 = vadd.f32 %v1083_v36, %v1055_v34  ;;  %v1112_v38 = vpop.f32.mrf.mxu3  ;;  %v1990_v34 = vld [vmem:[%s2723_s6 + $0x48] sm:$0xff] }
 0x158   :  { %v1995_v36 = vld [vmem:[%s2723_s6 + $0x68] sm:$0xff]  ;;  %1413 = vmatpush.msrb.mxu2 %v1990_v34  ;;  %1352 = vmatpush.msrb.mxu0 %v1330_v39 }
 0x159   :  { %v1113_v41 = vadd.f32 %v1112_v38, %v1084_v37  ;;  %v1985_v37 = vld [vmem:[%s2723_s6 + $0x28] sm:$0xff]  ;;  %v1989_v38 = vld [vmem:[%s2723_s6 + $0x40] sm:$0xff]  ;;  %1444 = vmatpush.msrb.mxu3 %v1995_v36 }
 0x15a   :  { %v1030_v42 = vpop.f32.mrf.mxu0  ;;  %1382 = vmatpush.msrb.mxu1 %v1985_v37  ;;  %1414 = vmatpush.msrb.mxu2 %v1989_v38 }
 0x15b   :  { %1137 = vst.msk [vmem:[#allocation3 + $0x18] sm:$0xff] %vm1133_vm1, %v1113_v41  ;;  %v1059_v49 = vpop.f32.mrf.mxu1  ;;  %v1031_v50 = vadd.f32 %v2534_v46, %v1030_v42  ;;  %v1984_v41 = vld [vmem:[%s2723_s6 + $0x20] sm:$0xff]  ;;  %1445 = vmatpush.msrb.mxu3 %v1994_v40 }
 0x15c   :  { %1383 = vmatpush.msrb.mxu1 %v1984_v41 }
 0x15d   :  { %v1060_v58 = vadd.f32 %v1059_v49, %v1031_v50 }
 0x15e   :  { %v1086_v45 = vpop.f32.mrf.mxu2 }
 0x15f   :  { %v1087_v47 = vadd.f32 %v1086_v45, %v1058_v44  ;;  %v1115_v48 = vpop.f32.mrf.mxu3 }
 0x161   :  { %v1116_v52 = vadd.f32 %v1115_v48, %v1087_v47 }
 0x162   :  { %v1147_v53 = vld [vmem:[#allocation3] ss:$4 sm:$0xff]  ;;  %v1190_v54 = vld [vmem:[#allocation3 + $0x1] ss:$4 sm:$0xff]  ;;  %v1234_v55 = vld [vmem:[#allocation3 + $0x2] ss:$4 sm:$0xff]  ;;  %v1033_v57 = vpop.f32.mrf.mxu0 }
 0x163   :  { %v1129_v51 = vsel %vm713_vm2, %v1116_v52, 0.0  ;;  %1951 = vmatmul.msk.f32.vlgmr.msra.gmra.mxu0 %vm1133_vm1, %v1147_v53  ;;  %1961 = vmatmul.msk.f32.vlgmr.msra.gmra.mxu1 %vm1133_vm1, %v1190_v54  ;;  %v1278_v56 = vld [vmem:[#allocation3 + $0x3] ss:$4 sm:$0xff]  ;;  %v1034_v62 = vadd.f32 %v2534_v46, %v1033_v57  ;;  %v1062_v0 = vpop.f32.mrf.mxu1 }
 0x164   :  { %1138 = vst.msk [vmem:[#allocation3 + $0x20] sm:$0xff] %vm1133_vm1, %v1129_v51  ;;  %1971 = vmatmul.msk.f32.vlgmr.msra.gmra.mxu2 %vm1133_vm1, %v1234_v55  ;;  %1981 = vmatmul.msk.f32.vlgmr.msra.gmra.mxu3 %vm1133_vm1, %v1278_v56  ;;  %v1460_v51 = vld [vmem:[%s2725_s8 + $0x8] sm:$0xff]  ;;  %v1459_v56 = vld [vmem:[%s2725_s8] sm:$0xff] }
 0x165   :  { %v1063_v1 = vadd.f32 %v1062_v0, %v1034_v62  ;;  %1483 = vmatpush.msra.mxu0 %v1460_v51  ;;  %v1491_v57 = vld [vmem:[%s2727_s10 + $0x8] sm:$0xff] }
 0x166   :  { %v1088_v59 = vpop.f32.mrf.mxu2  ;;  %1513 = vmatpush.msra.mxu1 %v1491_v57 }
 0x167   :  { %v1089_v60 = vadd.f32 %v1088_v59, %v1060_v58  ;;  %v1117_v61 = vpop.f32.mrf.mxu3  ;;  %1484 = vmatpush.msra.mxu0 %v1459_v56  ;;  %v2101_v58 = vld [vmem:[%s2724_s7] ss:$0 sm:$0xff] }
 0x169   :  { %v1118_v63 = vadd.f32 %v1117_v61, %v1089_v60 }
 0x16a   :  { %v1035_v2 = vpop.f32.mrf.mxu0 }
 0x16b   :  { %1139 = vst.msk [vmem:[#allocation3 + $0x28] sm:$0xff] %vm1133_vm1, %v1118_v63  ;;  %v1036_v6 = vadd.f32 %v2534_v46, %v1035_v2  ;;  %v1064_v8 = vpop.f32.mrf.mxu1  ;;  %v2100_v46 = vld [vmem:[%s2722_s5] ss:$0 sm:$0xff] }
 0x16d   :  { %v1065_v9 = vadd.f32 %v1064_v8, %v1036_v6  ;;  %v1520_v8 = vld [vmem:[%s2729_s12] sm:$0xff] }
 0x16e   :  { %v1091_v3 = vpop.f32.mrf.mxu2  ;;  %1544 = vmatpush.msra.mxu2 %v1520_v8 }
 0x16f   :  { %v1092_v4 = vadd.f32 %v1091_v3, %v1063_v1  ;;  %v1120_v5 = vpop.f32.mrf.mxu3 }
 0x171   :  { %v1121_v7 = vadd.f32 %v1120_v5, %v1092_v4 }
 0x173   :  { %1140 = vst.msk [vmem:[#allocation3 + $0x30] sm:$0xff] %vm1133_vm1, %v1121_v7  ;;  %v1490_v7 = vld [vmem:[%s2727_s10] sm:$0xff] }
 0x174   :  { %1514 = vmatpush.msra.mxu1 %v1490_v7 }
 0x176   :  { %v1093_v10 = vpop.f32.mrf.mxu2 }
 0x177   :  { %v1094_v11 = vadd.f32 %v1093_v10, %v1065_v9  ;;  %v1122_v12 = vpop.f32.mrf.mxu3  ;;  %v2102_v9 = vld [vmem:[%s2726_s9] ss:$0 sm:$0xff] }
 0x179   :  { %v1123_v13 = vadd.f32 %v1122_v12, %v1094_v11 }
 0x17b   :  { %1141 = vst.msk [vmem:[#allocation3 + $0x38] sm:$0xff] %vm1133_vm1, %v1123_v13  ;;  %v2103_v13 = vld [vmem:[%s2728_s11] ss:$0 sm:$0xff] }
 0x182   :  { %v1149_v14 = vld [vmem:[#allocation3 + $0x20] ss:$4 sm:$0xff]  ;;  %v1192_v15 = vld [vmem:[#allocation3 + $0x21] ss:$4 sm:$0xff]  ;;  %v1236_v16 = vld [vmem:[#allocation3 + $0x22] ss:$4 sm:$0xff] }
 0x183   :  { %1952 = vmatmul.msk.f32.gmra.mxu0 %vm1133_vm1, %v1149_v14  ;;  %1962 = vmatmul.msk.f32.gmra.mxu1 %vm1133_vm1, %v1192_v15  ;;  %v1280_v17 = vld [vmem:[#allocation3 + $0x23] ss:$4 sm:$0xff] }
 0x184   :  { %1972 = vmatmul.msk.f32.gmra.mxu2 %vm1133_vm1, %v1236_v16  ;;  %1982 = vmatmul.msk.f32.gmra.mxu3 %vm1133_vm1, %v1280_v17  ;;  %v2104_v17 = vld [vmem:[%s2730_s13] ss:$0 sm:$0xff] }
 0x1e0   :  { %v1181_v18 = vpop.f32.mrf.mxu0  ;;  %v1225_v23 = vpop.f32.mrf.mxu1 }
 0x1e1   :  { %v1187_v19 = vadd.f32 %v2100_v46, %v1181_v18 }
 0x1e3   :  { %v1231_v24 = vadd.f32 %v1225_v23, %v1187_v19 }
 0x1e7   :  { %v1269_v25 = vpop.f32.mrf.mxu2  ;;  %v1313_v27 = vpop.f32.mrf.mxu3 }
 0x1e8   :  { %v1275_v26 = vadd.f32 %v1269_v25, %v1231_v24 }
 0x1ea   :  { %v1319_v28 = vadd.f32 %v1313_v27, %v1275_v26 }
 0x1ec   :  { %1322 = vst.msk [vmem:[#allocation4] sm:$0xff] %vm1321_vm3, %v1319_v28 }
 0x200   :  { %v1184_v42 = vpop.f32.mrf.mxu0  ;;  %v1228_v44 = vpop.f32.mrf.mxu1 }
 0x201   :  { %v1188_v43 = vadd.f32 %v2100_v46, %v1184_v42 }
 0x203   :  { %v1232_v45 = vadd.f32 %v1228_v44, %v1188_v43 }
 0x207   :  { %v1272_v47 = vpop.f32.mrf.mxu2  ;;  %v1316_v49 = vpop.f32.mrf.mxu3 }
 0x208   :  { %v1276_v48 = vadd.f32 %v1272_v47, %v1232_v45 }
 0x20a   :  { %v1320_v50 = vadd.f32 %v1316_v49, %v1276_v48 }
 0x20c   :  { %1323 = vst.msk [vmem:[#allocation4 + $0x8] sm:$0xff] %vm1321_vm3, %v1320_v50 }
 0x213   :  { %v1329_v52 = vld [vmem:[#allocation4] ss:$4 sm:$0xf]  ;;  %v1359_v53 = vld [vmem:[#allocation4 + $0x1] ss:$4 sm:$0xf] }
 0x214   :  { %1983 = vmatmul.msk.f32.vlgmr.msrb.gmra.mxu0 %vm1321_vm3, %v1329_v52  ;;  %1988 = vmatmul.msk.f32.vlgmr.msrb.gmra.mxu1 %vm1321_vm3, %v1359_v53  ;;  %v1390_v54 = vld [vmem:[#allocation4 + $0x2] ss:$4 sm:$0xf]  ;;  %v1421_v55 = vld [vmem:[#allocation4 + $0x3] ss:$4 sm:$0xf] }
 0x215   :  { %1993 = vmatmul.msk.f32.vlgmr.msrb.gmra.mxu2 %vm1321_vm3, %v1390_v54  ;;  %1998 = vmatmul.msk.f32.vlgmr.msrb.gmra.mxu3 %vm1321_vm3, %v1421_v55 }
 0x291   :  { %v1354_v59 = vpop.f32.mrf.mxu0  ;;  %v1385_v61 = vpop.f32.mrf.mxu1 }
 0x292   :  { %v1357_v60 = vadd.f32 %v2101_v58, %v1354_v59 }
 0x294   :  { %v1388_v62 = vadd.f32 %v1385_v61, %v1357_v60 }
 0x298   :  { %v1416_v63 = vpop.f32.mrf.mxu2  ;;  %v1447_v1 = vpop.f32.mrf.mxu3 }
 0x299   :  { %v1419_v0 = vadd.f32 %v1416_v63, %v1388_v62 }
 0x29b   :  { %v1450_v2 = vadd.f32 %v1447_v1, %v1419_v0 }
 0x29d   :  { %1452 = vst.msk [vmem:[#allocation5] sm:$0xf] %vm1451_vm4, %v1450_v2 }
 0x2a4   :  { %v1453_v3 = vld [vmem:[#allocation5] ss:$2 sm:$0x3]  ;;  %v1456_v4 = vld [vmem:[#allocation5 + $0x1] ss:$2 sm:$0x3] }
 0x2a5   :  { %v1457_v5 = vadd.f32 %v1456_v4, %v1453_v3 }
 0x2a7   :  { %v1458_v6 = vmul.f32 0.5, %v1457_v5 }
 0x2a9   :  { %1999 = vmatmul.msk.f32.vlgmr.msra.gmra.mxu0 %vm1465_vm5, %v1458_v6 }
 0x326   :  { %v1486_v10 = vpop.f32.mrf.mxu0 }
 0x327   :  { %v1487_v11 = vadd.f32 %v2102_v9, %v1486_v10 }
 0x329   :  { %v1489_v12 = vmax.f32 %v1487_v11, 0.0 }
 0x32b   :  { %2000 = vmatmul.msk.f32.vlgmr.msra.gmra.mxu1 %vm1465_vm5, %v1489_v12 }
 0x3a8   :  { %v1516_v14 = vpop.f32.mrf.mxu1 }
 0x3a9   :  { %v1517_v15 = vadd.f32 %v2103_v13, %v1516_v14 }
 0x3ab   :  { %v1519_v16 = vmax.f32 %v1517_v15, 0.0 }
 0x3ad   :  { %2001 = vmatmul.msk.f32.vlgmr.msra.gmra.mxu2 %vm1525_vm6, %v1519_v16 }
 0x430   :  { %v1546_v46 = vpop.f32.mrf.mxu2 }
 0x431   :  { %v1547_v18 = vadd.f32 %v2104_v17, %v1546_v46 }
 0x433   :  { %1550 = vst.msk [vmem:[#allocation6] sm:$0x3] %vm1549_vm7, %v1547_v18 }
 0x434   :  { %1561 = dma.vmem_to_hbm [thread:$0]  %s1557_s28, 32, %s1559_s30, [#allocation7]  }
 0x435   :  { %2129 = dma.done.wait [#allocation7], 32  }
 0x436   :  { %2130 = vsyncadd [#allocation7], 4294967264 }
 0x437   :  { %1566 = vsyncpa [#allocation7], 1 }

</bundles_post_ra>
